<compile_context>
chip_gen: v6e
topology: v6e:2x2x1
jax: 0.10.0
libtpu: 0.0.40
codegen_flags: <defaults>
</compile_context>

<pallas_src>
import jax
import jax.numpy as jnp
from jax import lax
from jax.experimental import pallas as pl
from jax.experimental.pallas import tpu as pltpu


def _patch_expand_kernel(x_ref, w_ref, g_ref, b_ref, o_ref):
    # x_ref: (TR, W, dim)        input tokens (TR rows of H, full W)
    # w_ref: (2*dim, dim)        nn.Linear weight, native layout (out, in)
    # g_ref: (1, c)              LayerNorm gamma, c = dim // 2
    # b_ref: (1, c)              LayerNorm beta
    # o_ref: (TR, 2, W, 2*c)     p1-interleaved output block (p2 packed in lanes)
    TR, W, dim = x_ref.shape
    c = g_ref.shape[-1]
    T = TR * W

    x2 = x_ref[...].reshape(T, dim)
    # y = x @ W^T  (contract dim 1 of both operands; accumulate in f32 on the MXU)
    y = lax.dot_general(
        x2, w_ref[...],
        dimension_numbers=(((1,), (1,)), ((), ())),
        preferred_element_type=jnp.float32,
    )                                                    # (T, 2*dim) = (T, 4c), f32

    # --- grouped LayerNorm over 4 groups of width c (vectorized, one-pass var) ---
    yg = y.reshape(T, 4, c)
    mean = jnp.mean(yg, axis=-1, keepdims=True)          # (T, 4, 1)
    var = jnp.mean(yg * yg, axis=-1, keepdims=True) - mean * mean
    gamma = g_ref[...].astype(jnp.float32).reshape(1, 1, c)
    beta = b_ref[...].astype(jnp.float32).reshape(1, 1, c)
    yn = (yg - mean) * lax.rsqrt(var + 1e-5) * gamma + beta   # (T, 4, c)

    # --- fused pixel shuffle: p1 -> new row axis; p2 stays adjacent to c in lanes ---
    yn = yn.reshape(T, 4 * c).reshape(TR, W, 4 * c)
    lo = yn[:, :, : 2 * c]     # p1 = 0  (groups (0,0), (0,1))
    hi = yn[:, :, 2 * c:]      # p1 = 1  (groups (1,0), (1,1))
    o_ref[:, 0:1, :, :] = lo.reshape(TR, 1, W, 2 * c).astype(o_ref.dtype)
    o_ref[:, 1:2, :, :] = hi.reshape(TR, 1, W, 2 * c).astype(o_ref.dtype)


def _choose_row_tile(R, W, target_tokens=512):
    """Largest divisor TR of R with TR*W <= target_tokens; prefer a grid of >= 2."""
    divs = [d for d in range(1, R + 1) if R % d == 0 and d * W <= target_tokens]
    if not divs:
        return 1
    multi = [d for d in divs if R // d >= 2]
    return max(multi) if multi else max(divs)


def patch_expanding(x, w_expand, gamma, beta, *, target_tokens=512):
    """x: (B, H, W, dim) -> (B, 2H, 2W, dim // 2). w_expand: (2*dim, dim)."""
    B, H, W, dim = x.shape
    c = dim // 2
    R = B * H
    TR = _choose_row_tile(R, W, target_tokens)

    xr = x.reshape(R, W, dim)                 # contiguous view, free
    g2 = gamma.reshape(1, c)
    b2 = beta.reshape(1, c)

    out3 = pl.pallas_call(
        _patch_expand_kernel,
        out_shape=jax.ShapeDtypeStruct((R, 2, W, 2 * c), x.dtype),
        grid_spec=pltpu.PrefetchScalarGridSpec(
            num_scalar_prefetch=0,
            grid=(R // TR,),
            in_specs=[
                pl.BlockSpec((TR, W, dim), lambda i: (i, 0, 0)),
                pl.BlockSpec((2 * dim, dim), lambda i: (0, 0)),   # constant -> DMA'd once
                pl.BlockSpec((1, c), lambda i: (0, 0)),
                pl.BlockSpec((1, c), lambda i: (0, 0)),
            ],
            out_specs=pl.BlockSpec((TR, 2, W, 2 * c), lambda i: (i, 0, 0, 0)),
        ),
        compiler_params=pltpu.CompilerParams(
            dimension_semantics=("parallel",),
            vmem_limit_bytes=48 * 1024 * 1024,
        ),
    )(xr, w_expand, g2, b2)

    # (B*H, 2, W, 2c) -> (B, 2H, 2W, c): contiguous row-major reshape (no transpose,
    # no extra HBM pass) — the pixel shuffle already happened inside the kernel.
    return out3.reshape(B, 2 * H, 2 * W, c)


def _reference(x, w_expand, gamma, beta):
    """Pure-JAX reference mirroring the PyTorch forward."""
    B, H, W, dim = x.shape
    c = dim // 2
    y = jnp.einsum("bhwd,od->bhwo", x.astype(jnp.float32),
                   w_expand.astype(jnp.float32))          # (B, H, W, 2*dim)
    y = y.reshape(B, H, W, 2, 2, c)
    y = jnp.transpose(y, (0, 1, 3, 2, 4, 5)).reshape(B, 2 * H, 2 * W, c)
    mean = jnp.mean(y, axis=-1, keepdims=True)
    var = jnp.mean((y - mean) ** 2, axis=-1, keepdims=True)
    return (y - mean) * lax.rsqrt(var + 1e-5) * gamma + beta


if __name__ == "__main__":
    key = jax.random.PRNGKey(0)
    k_x, k_w, k_g, k_b = jax.random.split(key, 4)

    B, H, W, dim = 2, 8, 8, 32
    c = dim // 2

    x = jax.random.normal(k_x, (B, H, W, dim), dtype=jnp.float32)
    # nn.Linear(dim, 2*dim, bias=False): weight shape (2*dim, dim)
    w_expand = jax.random.normal(k_w, (2 * dim, dim), dtype=jnp.float32) * 0.05
    # nn.LayerNorm(dim // 2): gamma/beta shape (dim//2,)
    gamma = 1.0 + 0.1 * jax.random.normal(k_g, (c,), dtype=jnp.float32)
    beta = 0.1 * jax.random.normal(k_b, (c,), dtype=jnp.float32)

    out = patch_expanding(x, w_expand, gamma, beta)
    out = jax.block_until_ready(out)
    assert out.shape == (B, 2 * H, 2 * W, c), out.shape

    ref = _reference(x, w_expand, gamma, beta)
    assert jnp.allclose(out, ref, atol=2e-4, rtol=2e-4)

    print("KERNEL_OK")
</pallas_src>

<mosaic_0001>
module attributes {stable_mosaic.version = 11 : i64} {
  func.func @_patch_expand_kernel(%arg0: i32, %arg1: memref<8x8x32xf32, #tpu.memory_space<vmem>>, %arg2: memref<64x32xf32, #tpu.memory_space<vmem>>, %arg3: memref<1x16xf32, #tpu.memory_space<vmem>>, %arg4: memref<1x16xf32, #tpu.memory_space<vmem>>, %arg5: memref<8x2x8x32xf32, #tpu.memory_space<vmem>>) attributes {dimension_semantics = [#tpu.dimension_semantics<parallel>], iteration_bounds = array<i64: 2>, scalar_prefetch = 0 : i64, scratch_operands = 0 : i64, tpu.core_type = #tpu.core_type<tc>, window_params = [{transform_indices = @transform_0, window_bounds = array<i64: 8, 8, 32>}, {pipeline_mode = #tpu.pipeline_mode<synchronous>, transform_indices = @transform_1, window_bounds = array<i64: 64, 32>}, {pipeline_mode = #tpu.pipeline_mode<synchronous>, transform_indices = @transform_2, window_bounds = array<i64: 1, 16>}, {pipeline_mode = #tpu.pipeline_mode<synchronous>, transform_indices = @transform_3, window_bounds = array<i64: 1, 16>}, {transform_indices = @transform_4, window_bounds = array<i64: 8, 2, 8, 32>}]} {
    %c0 = arith.constant 0 : index
    %c0_0 = arith.constant 0 : index
    %c0_1 = arith.constant 0 : index
    %0 = vector.load %arg1[%c0, %c0_0, %c0_1] : memref<8x8x32xf32, #tpu.memory_space<vmem>>, vector<8x8x32xf32>
    %1 = vector.shape_cast %0 : vector<8x8x32xf32> to vector<64x32xf32>
    %c0_2 = arith.constant 0 : index
    %c0_3 = arith.constant 0 : index
    %2 = vector.load %arg2[%c0_2, %c0_3] : memref<64x32xf32, #tpu.memory_space<vmem>>, vector<64x32xf32>
    %cst = arith.constant dense<0.000000e+00> : vector<64x64xf32>
    %3 = tpu.matmul %1, %2, %cst {dimension_numbers = #tpu.dot_dimension_numbers<[1], [1], [0], [0], [0, 0, 1, 0], [], []>} : vector<64x32xf32>, vector<64x32xf32>, vector<64x64xf32> -> vector<64x64xf32>
    %4 = vector.shape_cast %3 : vector<64x64xf32> to vector<64x4x16xf32>
    %cst_4 = arith.constant dense<0.000000e+00> : vector<64x4xf32>
    %5 = vector.multi_reduction <add>, %4, %cst_4 [2] : vector<64x4x16xf32> to vector<64x4xf32>
    %6 = vector.shape_cast %5 : vector<64x4xf32> to vector<64x4x1xf32>
    %cst_5 = arith.constant 1.600000e+01 : f32
    %7 = vector.broadcast %cst_5 : f32 to vector<64x4x1xf32>
    %8 = arith.divf %6, %7 : vector<64x4x1xf32>
    %9 = arith.mulf %4, %4 : vector<64x4x16xf32>
    %cst_6 = arith.constant dense<0.000000e+00> : vector<64x4xf32>
    %10 = vector.multi_reduction <add>, %9, %cst_6 [2] : vector<64x4x16xf32> to vector<64x4xf32>
    %11 = vector.shape_cast %10 : vector<64x4xf32> to vector<64x4x1xf32>
    %cst_7 = arith.constant 1.600000e+01 : f32
    %12 = vector.broadcast %cst_7 : f32 to vector<64x4x1xf32>
    %13 = arith.divf %11, %12 : vector<64x4x1xf32>
    %14 = arith.mulf %8, %8 : vector<64x4x1xf32>
    %15 = arith.subf %13, %14 : vector<64x4x1xf32>
    %c0_8 = arith.constant 0 : index
    %c0_9 = arith.constant 0 : index
    %16 = vector.load %arg3[%c0_8, %c0_9] : memref<1x16xf32, #tpu.memory_space<vmem>>, vector<1x16xf32>
    %17 = vector.shape_cast %16 : vector<1x16xf32> to vector<1x1x16xf32>
    %c0_10 = arith.constant 0 : index
    %c0_11 = arith.constant 0 : index
    %18 = vector.load %arg4[%c0_10, %c0_11] : memref<1x16xf32, #tpu.memory_space<vmem>>, vector<1x16xf32>
    %19 = vector.shape_cast %18 : vector<1x16xf32> to vector<1x1x16xf32>
    %20 = vector.broadcast %8 : vector<64x4x1xf32> to vector<64x4x16xf32>
    %21 = arith.subf %4, %20 : vector<64x4x16xf32>
    %cst_12 = arith.constant 9.99999974E-6 : f32
    %22 = vector.broadcast %cst_12 : f32 to vector<64x4x1xf32>
    %23 = arith.addf %15, %22 : vector<64x4x1xf32>
    %24 = math.rsqrt %23 : vector<64x4x1xf32>
    %25 = vector.broadcast %24 : vector<64x4x1xf32> to vector<64x4x16xf32>
    %26 = arith.mulf %21, %25 : vector<64x4x16xf32>
    %27 = vector.broadcast %17 : vector<1x1x16xf32> to vector<64x4x16xf32>
    %28 = arith.mulf %26, %27 : vector<64x4x16xf32>
    %29 = vector.broadcast %19 : vector<1x1x16xf32> to vector<64x4x16xf32>
    %30 = arith.addf %28, %29 : vector<64x4x16xf32>
    %31 = vector.shape_cast %30 : vector<64x4x16xf32> to vector<64x64xf32>
    %32 = vector.shape_cast %31 : vector<64x64xf32> to vector<8x8x64xf32>
    %33 = vector.extract_strided_slice %32 {offsets = [0, 0, 0], sizes = [8, 8, 32], strides = [1, 1, 1]} : vector<8x8x64xf32> to vector<8x8x32xf32>
    %34 = vector.extract_strided_slice %32 {offsets = [0, 0, 32], sizes = [8, 8, 32], strides = [1, 1, 1]} : vector<8x8x64xf32> to vector<8x8x32xf32>
    %35 = vector.shape_cast %33 : vector<8x8x32xf32> to vector<8x1x8x32xf32>
    %c0_13 = arith.constant 0 : index
    %c0_14 = arith.constant 0 : index
    %c0_15 = arith.constant 0 : index
    %c0_16 = arith.constant 0 : index
    %36 = vector.load %arg5[%c0_13, %c0_14, %c0_15, %c0_16] : memref<8x2x8x32xf32, #tpu.memory_space<vmem>>, vector<8x1x8x32xf32>
    tpu.vector_store %arg5[%c0_13, %c0_14, %c0_15, %c0_16], %35 {strides = array<i32>} : memref<8x2x8x32xf32, #tpu.memory_space<vmem>>, vector<8x1x8x32xf32>,
    %37 = vector.shape_cast %34 : vector<8x8x32xf32> to vector<8x1x8x32xf32>
    %c0_17 = arith.constant 0 : index
    %c1 = arith.constant 1 : index
    %c0_18 = arith.constant 0 : index
    %c0_19 = arith.constant 0 : index
    %38 = vector.load %arg5[%c0_17, %c1, %c0_18, %c0_19] : memref<8x2x8x32xf32, #tpu.memory_space<vmem>>, vector<8x1x8x32xf32>
    tpu.vector_store %arg5[%c0_17, %c1, %c0_18, %c0_19], %37 {strides = array<i32>} : memref<8x2x8x32xf32, #tpu.memory_space<vmem>>, vector<8x1x8x32xf32>,
    return
  }
  func.func @transform_0(%arg0: i32) -> (i32, i32, i32) {
    %c0_i32 = arith.constant 0 : i32
    %c0_i32_0 = arith.constant 0 : i32
    %c0_i32_1 = arith.constant 0 : i32
    return %arg0, %c0_i32, %c0_i32_0 : i32, i32, i32
  }
  func.func @transform_1(%arg0: i32) -> (i32, i32) {
    %c0_i32 = arith.constant 0 : i32
    %c0_i32_0 = arith.constant 0 : i32
    %c0_i32_1 = arith.constant 0 : i32
    return %c0_i32, %c0_i32_0 : i32, i32
  }
  func.func @transform_2(%arg0: i32) -> (i32, i32) {
    %c0_i32 = arith.constant 0 : i32
    %c0_i32_0 = arith.constant 0 : i32
    %c0_i32_1 = arith.constant 0 : i32
    return %c0_i32, %c0_i32_0 : i32, i32
  }
  func.func @transform_3(%arg0: i32) -> (i32, i32) {
    %c0_i32 = arith.constant 0 : i32
    %c0_i32_0 = arith.constant 0 : i32
    %c0_i32_1 = arith.constant 0 : i32
    return %c0_i32, %c0_i32_0 : i32, i32
  }
  func.func @transform_4(%arg0: i32) -> (i32, i32, i32, i32) {
    %c0_i32 = arith.constant 0 : i32
    %c0_i32_0 = arith.constant 0 : i32
    %c0_i32_1 = arith.constant 0 : i32
    %c0_i32_2 = arith.constant 0 : i32
    return %arg0, %c0_i32, %c0_i32_0, %c0_i32_1 : i32, i32, i32, i32
  }
}

</mosaic_0001>

<bundles_post_ra>
// kernel: tpu_custom_call.1
= control target key start
LH: loop header
LB: loop body
LE: loop exit
PB: predicated region body
PF: predicated region fallthrough
CT: control target
= control target key end

     0   :  { %9 = vsyncpa [#allocation3], 0  ;;  %s5655_s0 = inlined_call_operand.hbm [shape: f32[16,8,32], index: 0, kind: input, shape index: {}]   ;;  %s5656_s1 = inlined_call_operand.vmem [shape: f32[64,32], index: 1, kind: input, shape index: {}]   ;;  %s5657_s2 = inlined_call_operand.vmem [shape: f32[1,16], index: 2, kind: input, shape index: {}]   ;;  %s5658_s3 = inlined_call_operand.vmem [shape: f32[1,16], index: 3, kind: input, shape index: {}]   ;;  %s5659_s4 = inlined_call_operand.hbm [shape: f32[16,2,8,32], index: 4, kind: output, shape index: {}]  }
   0x1   :  { %11 = vsyncpa [#allocation3 + $0x1], 0 }
   0x2   :  { %12 = vsyncpa [#allocation4], 0 }
   0x3   :  { %14 = vsyncpa [#allocation4 + $0x1], 0  ;;  %s3346_s15 = smov 0   ;;  %s3348_s16 = smov 0  }
   0x4   :  { %s3350_s17 = smov 0   ;;  %s3352_s18 = smov 0  }
   0x5 LB: > { %s3367_s19 = sadd.s32 4294967295, %s3304_s18   ;;  %s2919_s20 = sadd.s32 4294967294, %s3304_s18   ;;  %s3304_s18 = sphi %s3352_s18, %s6024_s18   ;;  %s3300_s17 = sphi %s3350_s17, %s6023_s17   ;;  %s3296_s16 = sphi %s3348_s16, %s6022_s16   ;;  %s3292_s15 = sphi %s3346_s15, %s6021_s15  }
   0x6   : > { %s3371_s21 = sadd.s32 1, %s3304_s18   ;;  %s27_s22 = sadd.s32 1, %s3300_s17 }
   0x7   : > { %s24_s23 = ssub.s32 %s3304_s18, %s3371_s21  ;;  %p34_p0 = scmp.ne.s32.totalorder %s3300_s17, %s3296_s16 }
   0x8   : > { %p25_p1 = scmp.eq.s32.totalorder %s24_s23, 0  ;;  %p35_p2 = scmp.eq.s32.totalorder %s3304_s18, 0 }
   0x9   : > { %p40_p3 = scmp.ne.s32.totalorder %s3296_s16, %s3292_s15  ;;  %p41_p4 = scmp.eq.s32.totalorder %s3367_s19, 0 }
   0xa   : > { %s3383_s24 = scalar_select %p25_p1, %s3300_s17, %s27_s22  }
   0xb   : > { %p3385_p5 = por %p35_p2, %p34_p0  ;;  %p3389_p6 = por %p41_p4, %p40_p3 }
   0xc   : > { %p127_p7 = scmp.eq.s32.totalorder %s3367_s19, 1  ;;  %p133_p8 = scmp.eq.s32.totalorder %s2919_s20, 1 }
   0xd   : > { %s5773_s26 = scalar_select %p3389_p6, 1, 0 }
   0xe   : > { %p3035_p10 = scmp.lt.s32.totalorder %s3304_s18, 2  ;;  %p3396_p11 = por %p127_p7, %p34_p0 }
   0xf   : > { %p3400_p12 = por %p133_p8, %p40_p3  ;;  %s162_s29 = sand.u32 1, %s3300_s17  }
  0x10   : > { %s5774_s27 = scalar_select %p3396_p11, 1, 0 }
  0x11   : > { %s5775_s28 = scalar_select %p3400_p12, 1, 0 }
  0x12   : > { %s2960_s30 = sshll.u32 %s3304_s18, 10  ;;  %s2922_s5 = sshll.u32 %s162_s29, 6 }
  0x13   : > { %s3409_s8 = scalar_lea.hbm %s5655_s0, %s2960_s30  ;;  %s166_s9 = scalar_lea.vmem [#allocation2], %s2922_s5 }
  0x14   : > { %s173_s10 = sshll.u32 %s166_s9, 4  ;;  %p3413_p13 = pnand %p3035_p10, %p3385_p5  ;;  %s3417_s10 = int_to_ptr.vmem [resolvable:$true] %s173_s10 }
  0x15   : > { %s3419_s12 = scalar_lea.sflag [#allocation3], %s162_s29  ;;  %s3212_s13 = scalar_lea.hbm %s3409_s8, 1024 }
  0x16   : > { %p3213_p0 = scmp.ne.s32.totalorder %s3409_s8, %s3212_s13  ;;  %p3214_p1 = pneg %p3413_p13 }
  0x17   : > { %s3217_s22 = scalar_lea.hbm %s5655_s0, 2048  ;;  %p3218_p4 = scmp.lt.s32.totalorder %s3409_s8, %s5655_s0 }
  0x18   : > { %p3215_p2 = pnand %p3214_p1, %p3213_p0  ;;  %p3219_p5 = scmp.lt.s32.totalorder %s3217_s22, %s3212_s13 }
  0x1a   : > { %p3216_p3 = pneg %p3215_p2  ;;  %p3220_p7 = por %p3219_p5, %p3218_p4 }
  0x1c   : > { %p3221_p8 = pnand %p3220_p7, %p3216_p3 }
  0x1e   : > { %3224 = shalt.err (!%p3221_p8)
}
  0x1f   : > { %s3225_s29 = scalar_lea.vmem %s3417_s10, 1024  ;;  %s3306_s30 = smov [#allocation2]  }
  0x20   : > { %p3226_p10 = scmp.ne.s32.totalorder %s3417_s10, %s3225_s29  ;;  %s3230_s5 = sshll.u32 %s3306_s30, 4  ;;  %s3231_s5 = int_to_ptr.vmem [resolvable:$false] %s3230_s5 }
  0x21   : > { %s3232_s6 = scalar_lea.vmem %s3231_s5, 2048  ;;  %p3233_p2 = scmp.lt.s32.totalorder %s3417_s10, %s3231_s5 }
  0x22   : > { %p3228_p9 = pnand %p3226_p10, %p3214_p1  ;;  %p3234_p12 = scmp.lt.s32.totalorder %s3232_s6, %s3225_s29 }
  0x24   : > { %p3229_p0 = pneg %p3228_p9  ;;  %p3235_p11 = por %p3234_p12, %p3233_p2 }
  0x26   : > { %p3236_p6 = pnand %p3235_p11, %p3229_p0 }
  0x28   : > { %3239 = shalt.err (!%p3236_p6)
}
  0x29   : > { %s3307_s7 = smov 128   ;;  %s3308_s9 = smov 8  }
  0x2a   : > { %3030 = dma.hbm_to_vmem [thread:$0]  (!%p3413_p13), %s3409_s8, 1024, %s3417_s10, %s3419_s12, %s3307_s7, %s3307_s7, %s3308_s9  }
  0x2b   : > { %p2925_p9 = scmp.ge.s32.totalorder %s3304_s18, 1  ;;  %p181_p1 = scmp.lt.s32.totalorder %s3304_s18, 3 }
  0x2d   : > { %p182_p3 = pnand %p2925_p9, %p181_p1 }
  0x2f   : > { %185 = sbr.rel (%p182_p3) target bundleno = 1126 (0x466), region = 36 }
  0x34   : > { %s3443_s13 = sand.u32 1, %s3296_s16   ;;  %p5777_p6 = scmp.ne.s32.totalorder %s5773_s26, 0 }
  0x35   : > { %s2926_s14 = sshll.u32 %s3443_s13, 6  ;;  %s188_s20 = scalar_lea.sflag [#allocation3], %s3443_s13 }
  0x36   : > { %s3447_s22 = scalar_lea.vmem [#allocation2], %s2926_s14 }
  0x37   : > { %3283 = dma.done.wait (%p5777_p6), %s188_s20, 1024  }
  0x38   : > { %3285 = vsyncadd (%p5777_p6), %s188_s20, 4294966272  ;;  %vm234_vm0 = vcmask 261120   ;;  %v233_v0 = vld [vmem:[%s5656_s1 + $0x38] sm:$0xff]  ;;  %v232_v1 = vld [vmem:[%s5656_s1 + $0x30] sm:$0xff]  ;;  %s3309_s10 = smov 112   ;;  %s3310_s11 = smov 96   ;;  %v473_v28 = vlaneseq }
  0x39   : > { %2979 = vmatprep.subr.msk.mxu0 %vm234_vm0, %v233_v0  ;;  %3007 = vmatprep.subr.msk.mxu1 %vm234_vm0, %v233_v0  ;;  %v218_v2 = vld [vmem:[%s3447_s22] sm:$0xff]  ;;  %v231_v4 = vld [vmem:[%s5656_s1 + $0x28] sm:$0xff]  ;;  %v229_v6 = vld [vmem:[%s5656_s1 + $0x18] sm:$0xff]  ;;  %v3312_v26 = vmov 1983009808   ;;  %vm1012_vm1 = vcmask 125952  }
  0x3a   : > { %2980 = vmatpush3.xpose.msk.msra.mxu0 %vm234_vm0, %v233_v0  ;;  %3015 = vmatpush3.xpose.msk.msra.mxu1 %vm234_vm0, %v233_v0  ;;  %v222_v3 = vld [vmem:[%s3447_s22 + $0x20] sm:$0xff]  ;;  %v228_v7 = vld [vmem:[%s5656_s1 + $0x10] sm:$0xff]  ;;  %v227_v8 = vld [vmem:[%s5656_s1 + $0x8] sm:$0xff]  ;;  %v471_v27 = vunpack.c.l.s4 %v3312_v26  ;;  %v474_v32 = vshrl.u32 %v473_v28, 7  ;;  %v3313_v33 = vmov 1934713408  }
  0x3b   : > { %2981 = vmatprep.subr.msk.mxu0 %vm234_vm0, %v232_v1  ;;  %3008 = vmatprep.subr.msk.mxu1 %vm234_vm0, %v232_v1  ;;  %v230_v5 = vld [vmem:[%s5656_s1 + $0x20] sm:$0xff]  ;;  %v219_v10 = vld [vmem:[%s3447_s22 + $0x8] sm:$0xff]  ;;  %v220_v12 = vld [vmem:[%s3447_s22 + $0x10] sm:$0xff]  ;;  %v503_v34 = vunpack.c.l.s4 %v3313_v33  ;;  %s3315_s29 = smov 16   ;;  %s3316_s30 = smov 32   ;;  %vm2756_vm2 = vcmask 130048  }
  0x3c   : > { %2995 = vmatprep.mubr.msk.f32.mxu0 %vm234_vm0, %v218_v2  ;;  %3001 = vmatprep.mubr.msk.f32.mxu1 %vm234_vm0, %v222_v3  ;;  %v226_v9 = vld [vmem:[%s5656_s1] sm:$0xff]  ;;  %v223_v11 = vld [vmem:[%s3447_s22 + $0x28] sm:$0xff]  ;;  %v224_v13 = vld [vmem:[%s3447_s22 + $0x30] sm:$0xff]  ;;  %v472_v31 = vunpack.c.0.s8 %v471_v27  ;;  %s3317_s5 = smov 48   ;;  %vm2773_vm3 = vcmask 392192   ;;  %s2927_s20 = sshll.u32 %s3443_s13, 7 }
  0x3d   : > { %v221_v14 = vld [vmem:[%s3447_s22 + $0x18] sm:$0xff]  ;;  %v504_v39 = vunpack.c.0.s8 %v503_v34  ;;  %s5397_s8 = scalar_lea.vmem [#allocation5], %s2927_s20  ;;  %p6018_p12 = scmp.ne.s32.totalorder %s5774_s27, 0 }
  0x3e   : > { %2982 = vmatpush3.xpose.msk.msra.mxu0 %vm234_vm0, %v232_v1  ;;  %3016 = vmatpush3.xpose.msk.msra.mxu1 %vm234_vm0, %v232_v1  ;;  %v225_v15 = vld [vmem:[%s3447_s22 + $0x38] sm:$0xff]  ;;  %s3311_s22 = smov 80   ;;  %v3587_v37 = vsub.s32 %v472_v31, %v474_v32  ;;  %s3318_s25 = smov [#allocation5]  }
  0x3f   : > { %2983 = vmatprep.subr.msk.mxu0 %vm234_vm0, %v231_v4  ;;  %3009 = vmatprep.subr.msk.mxu1 %vm234_vm0, %v231_v4  ;;  %v3594_v46 = vsub.s32 %v504_v39, %v474_v32 }
  0x40   : > { %5778 = vst [vmem:[#allocation8_spill] sm:$0xff] %v3587_v37 }
  0x41   : > { %5779 = vst [vmem:[#allocation9_spill] sm:$0xff] %v3594_v46 }
  0x42   : > { %2984 = vmatpush3.xpose.msk.msra.mxu0 %vm234_vm0, %v231_v4  ;;  %3017 = vmatpush3.xpose.msk.msra.mxu1 %vm234_vm0, %v231_v4 }
  0x43   : > { %2985 = vmatprep.subr.msk.mxu0 %vm234_vm0, %v230_v5  ;;  %3010 = vmatprep.subr.msk.mxu1 %vm234_vm0, %v230_v5 }
  0x46   : > { %2986 = vmatpush3.xpose.msk.msra.mxu0 %vm234_vm0, %v230_v5  ;;  %3018 = vmatpush3.xpose.msk.msra.mxu1 %vm234_vm0, %v230_v5 }
  0x47   : > { %2987 = vmatprep.subr.msk.mxu0 %vm234_vm0, %v229_v6  ;;  %3011 = vmatprep.subr.msk.mxu1 %vm234_vm0, %v229_v6 }
  0x4a   : > { %2988 = vmatpush3.xpose.msk.msra.mxu0 %vm234_vm0, %v229_v6  ;;  %3019 = vmatpush3.xpose.msk.msra.mxu1 %vm234_vm0, %v229_v6 }
  0x4b   : > { %2989 = vmatprep.subr.msk.mxu0 %vm234_vm0, %v228_v7  ;;  %3012 = vmatprep.subr.msk.mxu1 %vm234_vm0, %v228_v7 }
  0x4e   : > { %2990 = vmatpush3.xpose.msk.msra.mxu0 %vm234_vm0, %v228_v7  ;;  %3020 = vmatpush3.xpose.msk.msra.mxu1 %vm234_vm0, %v228_v7 }
  0x4f   : > { %2991 = vmatprep.subr.msk.mxu0 %vm234_vm0, %v227_v8  ;;  %3013 = vmatprep.subr.msk.mxu1 %vm234_vm0, %v227_v8 }
  0x52   : > { %2992 = vmatpush3.xpose.msk.msra.mxu0 %vm234_vm0, %v227_v8  ;;  %3021 = vmatpush3.xpose.msk.msra.mxu1 %vm234_vm0, %v227_v8 }
  0x53   : > { %2993 = vmatprep.subr.msk.mxu0 %vm234_vm0, %v226_v9  ;;  %3014 = vmatprep.subr.msk.mxu1 %vm234_vm0, %v226_v9 }
  0x56   : > { %2994 = vmatpush3.xpose.msk.msra.mxu0 %vm234_vm0, %v226_v9  ;;  %3022 = vmatpush3.xpose.msk.msra.mxu1 %vm234_vm0, %v226_v9 }
  0x59   : > { %2996 = vmatmul.mubr.msk.f32.vlgmr.msra.gmra.mxu0 %vm234_vm0, %v219_v10  ;;  %3002 = vmatmul.mubr.msk.f32.vlgmr.msra.gmra.mxu1 %vm234_vm0, %v223_v11 }
  0x5a   : > { %2998 = vmatprep.mubr.msk.f32.mxu0 %vm234_vm0, %v220_v12  ;;  %3004 = vmatprep.mubr.msk.f32.mxu1 %vm234_vm0, %v224_v13 }
  0x5d   : > { %2999 = vmatmul.mubr.msk.f32.gmra.mxu0 %vm234_vm0, %v221_v14  ;;  %3005 = vmatmul.mubr.msk.f32.gmra.mxu1 %vm234_vm0, %v225_v15 }
 0x119   : > { %v3525_v16 = vpop.f32.mrf.mxu0  ;;  %v3527_v17 = vpop.f32.mrf.mxu1 }
 0x11a   : > { %406 = vrot.lane.b32.xlu1 %v3527_v17, %s3309_s10  ;;  %398 = vrot.lane.b32.xlu0 %v3525_v16, %s3309_s10 }
 0x11b   : > { %v3533_v18 = vpop.f32.mrf.mxu0  ;;  %v3539_v19 = vpop.f32.mrf.mxu1 }
 0x11d   : > { %v3551_v20 = vpop.f32.mrf.mxu0  ;;  %v3556_v21 = vpop.f32.mrf.mxu1 }
 0x11e   : > { %422 = vrot.lane.b32.xlu1 %v3525_v16, %s3310_s11  ;;  %396 = vrot.lane.b32.xlu0 %v3533_v18, %s3309_s10 }
 0x11f   : > { %v3561_v22 = vpop.f32.mrf.mxu1  ;;  %v3567_v23 = vpop.f32.mrf.mxu0 }
 0x122   : > { %430 = vrot.lane.b32.xlu1 %v3527_v17, %s3310_s11  ;;  %404 = vrot.lane.b32.xlu0 %v3539_v19, %s3309_s10 }
 0x126   : > { %446 = vrot.lane.b32.xlu1 %v3525_v16, %s3311_s22  ;;  %420 = vrot.lane.b32.xlu0 %v3533_v18, %s3310_s11 }
 0x12a   : > { %454 = vrot.lane.b32.xlu1 %v3527_v17, %s3311_s22  ;;  %428 = vrot.lane.b32.xlu0 %v3539_v19, %s3310_s11 }
 0x12e   : > { %444 = vrot.lane.b32.xlu0 %v3533_v18, %s3311_s22  ;;  %402 = vrot.lane.b32.xlu1 %v3551_v20, %s3309_s10 }
 0x132   : > { %452 = vrot.lane.b32.xlu0 %v3539_v19, %s3311_s22  ;;  %410 = vrot.lane.b32.xlu1 %v3556_v21, %s3309_s10 }
 0x136   : > { %408 = vrot.lane.b32.xlu0 %v3561_v22, %s3309_s10  ;;  %426 = vrot.lane.b32.xlu1 %v3551_v20, %s3310_s11 }
 0x13a   : > { %434 = vrot.lane.b32.xlu1 %v3556_v21, %s3310_s11  ;;  %424 = vrot.lane.b32.xlu0 %v3567_v23, %s3310_s11 }
 0x13e   : > { %450 = vrot.lane.b32.xlu1 %v3551_v20, %s3311_s22  ;;  %432 = vrot.lane.b32.xlu0 %v3561_v22, %s3310_s11 }
 0x142   : > { %458 = vrot.lane.b32.xlu1 %v3556_v21, %s3311_s22  ;;  %448 = vrot.lane.b32.xlu0 %v3567_v23, %s3311_s22 }
 0x146   : > { %456 = vrot.lane.b32.xlu0 %v3561_v22, %s3311_s22  ;;  %400 = vrot.lane.b32.xlu1 %v3567_v23, %s3309_s10  ;;  %s2962_s10 = sshll.u32 %s3367_s19, 11  ;;  %s2832_s19 = scalar_lea.sflag [#allocation4], %s3443_s13 }
 0x147   : > { %s5606_s26 = scalar_lea.hbm %s5659_s4, %s2962_s10 }
 0x18c   : > { %v3581_v24 = vpop.permute.xlu1 %406  ;;  %v399_v25 = vpop.permute.xlu0 %398 }
 0x190   : > { %v423_v29 = vpop.permute.xlu1 %422  ;;  %v3583_v30 = vpop.permute.xlu0 %396 }
 0x191   : > { %v536_v38 = vcombine.low %v3525_v16, %v423_v29  ;;  %v537_v47 = vcombine.high %v3525_v16, %v423_v29 }
 0x193   : > { %v544_v44 = vrot.slane %v536_v38, %v3587_v37  ;;  %v551_v55 = vrot.slane %v537_v47, %v3587_v37 }
 0x194   : > { %v431_v35 = vpop.permute.xlu1 %430  ;;  %v3585_v36 = vpop.permute.xlu0 %404 }
 0x195   : > { %v808_v0 = vcombine.low %v3527_v17, %v431_v35  ;;  %v809_v15 = vcombine.high %v3527_v17, %v431_v35 }
 0x197   : > { %v816_v8 = vrot.slane %v808_v0, %v3587_v37  ;;  %v823_v17 = vrot.slane %v809_v15, %v3587_v37 }
 0x198   : > { %v447_v40 = vpop.permute.xlu1 %446  ;;  %v3590_v41 = vpop.permute.xlu0 %420 }
 0x199   : > { %v552_v42 = vcombine.low %v399_v25, %v447_v40  ;;  %v553_v43 = vcombine.high %v399_v25, %v447_v40  ;;  %v468_v52 = vcombine.low %v3533_v18, %v3590_v41  ;;  %v5663_v25 = vmov 0.0  }
 0x19a   : > { %v469_v39 = vcombine.high %v3533_v18, %v3590_v41 }
 0x19b   : > { %v560_v45 = vrot.slane %v552_v42, %v3587_v37  ;;  %v567_v51 = vrot.slane %v553_v43, %v3587_v37  ;;  %v476_v62 = vrot.slane %v468_v52, %v3587_v37 }
 0x19c   : > { %v3597_v48 = vpop.permute.xlu0 %428  ;;  %v455_v53 = vpop.permute.xlu1 %454  ;;  %v483_v18 = vrot.slane %v469_v39, %v3587_v37 }
 0x19d   : > { %v568_v49 = vcombine.low %v544_v44, %v560_v45  ;;  %v569_v50 = vcombine.high %v544_v44, %v560_v45  ;;  %v584_v60 = vcombine.low %v551_v55, %v567_v51  ;;  %v824_v61 = vcombine.low %v3581_v24, %v455_v53 }
 0x19e   : > { %v585_v4 = vcombine.high %v551_v55, %v567_v51  ;;  %v825_v11 = vcombine.high %v3581_v24, %v455_v53  ;;  %v740_v55 = vcombine.low %v3539_v19, %v3597_v48 }
 0x19f   : > { %v3603_v54 = vrot.slane %v568_v49, %v3594_v46  ;;  %v3610_v59 = vrot.slane %v569_v50, %v3594_v46  ;;  %v832_v5 = vrot.slane %v824_v61, %v3587_v37  ;;  %v3620_v6 = vrot.slane %v584_v60, %v3594_v46 }
 0x1a0   : > { %v445_v56 = vpop.permute.xlu0 %444  ;;  %v3635_v14 = vrot.slane %v585_v4, %v3594_v46  ;;  %v839_v24 = vrot.slane %v825_v11, %v3587_v37 }
 0x1a1   : > { %v484_v57 = vcombine.low %v3583_v30, %v445_v56  ;;  %v1037_v58 = vsel %vm1012_vm1, %v3603_v54, 0.0  ;;  %v1043_v3 = vsel %vm1012_vm1, %v3610_v59, 0.0  ;;  %v840_v12 = vcombine.low %v816_v8, %v832_v5 }
 0x1a2   : > { %1038 = vadd.xlane.f32.xlu1 %v1037_v58  ;;  %v1049_v13 = vsel %vm1012_vm1, %v3620_v6, 0.0  ;;  %v3642_v26 = vcombine.high %v3603_v54, %v5663_v25  ;;  %v841_v27 = vcombine.high %v816_v8, %v832_v5  ;;  %v1055_v28 = vsel %vm1012_vm1, %v3635_v14, 0.0 }
 0x1a3   : > { %v492_v63 = vrot.slane %v484_v57, %v3587_v37  ;;  %v3648_v29 = vrot.slane %v840_v12, %v3594_v46  ;;  %v3655_v32 = vcombine.high %v3610_v59, %v5663_v25  ;;  %v856_v33 = vcombine.low %v823_v17, %v839_v24 }
 0x1a4   : > { %v1040_v31 = vsel %vm1012_vm1, %v3642_v26, 0.0  ;;  %v485_v34 = vcombine.high %v3583_v30, %v445_v56  ;;  %v3661_v38 = vrot.slane %v841_v27, %v3594_v46  ;;  %v3669_v42 = vcombine.high %v3620_v6, %v5663_v25  ;;  %v453_v47 = vpop.permute.xlu0 %452 }
 0x1a5   : > { %v500_v1 = vcombine.low %v476_v62, %v492_v63  ;;  %v501_v2 = vcombine.high %v476_v62, %v492_v63  ;;  %v1133_v35 = vsel %vm1012_vm1, %v3648_v29, 0.0  ;;  %v1046_v40 = vsel %vm1012_vm1, %v3655_v32, 0.0 }
 0x1a6   : > { %1044 = vadd.xlane.f32.xlu1 %v1043_v3  ;;  %v857_v43 = vcombine.high %v823_v17, %v839_v24  ;;  %v499_v30 = vrot.slane %v485_v34, %v3587_v37  ;;  %v1139_v44 = vsel %vm1012_vm1, %v3661_v38, 0.0  ;;  %v3675_v45 = vrot.slane %v856_v33, %v3594_v46 }
 0x1a7   : > { %v3623_v7 = vrot.slane %v500_v1, %v3594_v46  ;;  %v3629_v10 = vrot.slane %v501_v2, %v3594_v46  ;;  %v1052_v41 = vsel %vm1012_vm1, %v3669_v42, 0.0  ;;  %v3682_v49 = vcombine.high %v3635_v14, %v5663_v25 }
 0x1a8   : > { %v516_v50 = vcombine.low %v483_v18, %v499_v30  ;;  %v756_v51 = vcombine.low %v3585_v36, %v453_v47  ;;  %v1145_v52 = vsel %vm1012_vm1, %v3675_v45, 0.0  ;;  %v3688_v53 = vrot.slane %v857_v43, %v3594_v46 }
 0x1a9   : > { %5780 = vst [vmem:[#allocation10_spill] sm:$0xff] %v3623_v7  ;;  %v1013_v9 = vsel %vm1012_vm1, %v3623_v7, 0.0  ;;  %5781 = vst [vmem:[#allocation11_spill] sm:$0xff] %v3629_v10  ;;  %v1019_v16 = vsel %vm1012_vm1, %v3629_v10, 0.0  ;;  %v1058_v56 = vsel %vm1012_vm1, %v3682_v49, 0.0  ;;  %v3696_v57 = vcombine.high %v3648_v29, %v5663_v25 }
 0x1aa   : > { %1014 = vadd.xlane.f32.xlu0 %v1013_v9  ;;  %1050 = vadd.xlane.f32.xlu1 %v1049_v13  ;;  %5782 = vst [vmem:[#allocation12_spill] sm:$0xff] %v3682_v49  ;;  %5783 = vst [vmem:[#allocation13_spill] sm:$0xff] %v3688_v53  ;;  %v517_v58 = vcombine.high %v483_v18, %v499_v30  ;;  %v764_v60 = vrot.slane %v756_v51, %v3587_v37  ;;  %v1151_v61 = vsel %vm1012_vm1, %v3688_v53, 0.0 }
 0x1ab   : > { %5784 = vst [vmem:[#allocation14_spill] sm:$0xff] %v3696_v57  ;;  %v3702_v62 = vrot.slane %v516_v50, %v3594_v46  ;;  %v748_v63 = vrot.slane %v740_v55, %v3587_v37  ;;  %v1136_v0 = vsel %vm1012_vm1, %v3696_v57, 0.0  ;;  %v3709_v1 = vcombine.high %v3661_v38, %v5663_v25 }
 0x1ac   : > { %v757_v2 = vcombine.high %v3585_v36, %v453_v47  ;;  %v3715_v5 = vrot.slane %v517_v58, %v3594_v46  ;;  %v741_v8 = vcombine.high %v3539_v19, %v3597_v48  ;;  %v3723_v11 = vcombine.high %v3675_v45, %v5663_v25 }
 0x1ad   : > { %5785 = vst [vmem:[#allocation15_spill] sm:$0xff] %v3702_v62  ;;  %5786 = vst [vmem:[#allocation16_spill] sm:$0xff] %v3709_v1  ;;  %v772_v3 = vcombine.low %v748_v63, %v764_v60  ;;  %v1025_v4 = vsel %vm1012_vm1, %v3702_v62, 0.0  ;;  %v1142_v9 = vsel %vm1012_vm1, %v3709_v1, 0.0  ;;  %v773_v12 = vcombine.high %v748_v63, %v764_v60 }
 0x1ae   : > { %1020 = vadd.xlane.f32.xlu0 %v1019_v16  ;;  %1056 = vadd.xlane.f32.xlu1 %v1055_v28  ;;  %5787 = vst [vmem:[#allocation17_spill] sm:$0xff] %v3715_v5  ;;  %5788 = vst [vmem:[#allocation18_spill] sm:$0xff] %v3723_v11  ;;  %v771_v36 = vrot.slane %v757_v2, %v3587_v37  ;;  %v1031_v13 = vsel %vm1012_vm1, %v3715_v5, 0.0  ;;  %v755_v19 = vrot.slane %v741_v8, %v3587_v37 }
 0x1af   : > { %v3729_v15 = vrot.slane %v772_v3, %v3594_v46  ;;  %v1148_v48 = vsel %vm1012_vm1, %v3723_v11, 0.0  ;;  %v3736_v16 = vcombine.high %v3688_v53, %v5663_v25  ;;  %v3741_v28 = vrot.slane %v773_v12, %v3594_v46 }
 0x1b0   : > { %v788_v24 = vcombine.low %v755_v19, %v771_v36  ;;  %v789_v33 = vcombine.high %v755_v19, %v771_v36  ;;  %v3771_v18 = vcombine.high %v3715_v5, %v5663_v25  ;;  %v1278_v50 = vmul.f32 %v3603_v54, %v3603_v54 }
 0x1b1   : > { %5789 = vst [vmem:[#allocation19_spill] sm:$0xff] %v3729_v15  ;;  %5790 = vst [vmem:[#allocation20_spill] sm:$0xff] %v3736_v16  ;;  %v1109_v27 = vsel %vm1012_vm1, %v3729_v15, 0.0  ;;  %v1154_v17 = vsel %vm1012_vm1, %v3736_v16, 0.0  ;;  %v1115_v34 = vsel %vm1012_vm1, %v3741_v28, 0.0  ;;  %v3783_v55 = vcombine.high %v3729_v15, %v5663_v25 }
 0x1b2   : > { %1041 = vadd.xlane.f32.xlu0 %v1040_v31  ;;  %1134 = vadd.xlane.f32.xlu1 %v1133_v35  ;;  %5791 = vst [vmem:[#allocation21_spill] sm:$0xff] %v3741_v28  ;;  %v3747_v31 = vcombine.high %v3629_v10, %v5663_v25  ;;  %v3752_v35 = vrot.slane %v788_v24, %v3594_v46  ;;  %5796 = vst [vmem:[#allocation26_spill] sm:$0xff] %v3771_v18 }
 0x1b3   : > { %v3763_v30 = vrot.slane %v789_v33, %v3594_v46  ;;  %5797 = vst [vmem:[#allocation27_spill] sm:$0xff] %v3783_v55  ;;  %v1280_v58 = vmul.f32 %v3610_v59, %v3610_v59  ;;  %v1112_v60 = vsel %vm1012_vm1, %v3783_v55, 0.0  ;;  %v1312_v33 = vmul.f32 %v3661_v38, %v3661_v38 }
 0x1b4   : > { %5792 = vst [vmem:[#allocation22_spill] sm:$0xff] %v3747_v31  ;;  %5793 = vst [vmem:[#allocation23_spill] sm:$0xff] %v3752_v35  ;;  %v1022_v39 = vsel %vm1012_vm1, %v3747_v31, 0.0  ;;  %v1121_v43 = vsel %vm1012_vm1, %v3752_v35, 0.0 }
 0x1b5   : > { %5795 = vst [vmem:[#allocation25_spill] sm:$0xff] %v3763_v30  ;;  %v1364_v63 = vsel %vm1012_vm1, %v1280_v58, 0.0  ;;  %v1283_v58 = vmul.f32 %v3669_v42, %v3669_v42 }
 0x1b6   : > { %1047 = vadd.xlane.f32.xlu0 %v1046_v40  ;;  %1140 = vadd.xlane.f32.xlu1 %v1139_v44  ;;  %v3758_v40 = vcombine.high %v3702_v62, %v5663_v25  ;;  %v3765_v44 = vpop.permute.xlu1 %402 }
 0x1b8   : > { %5794 = vst [vmem:[#allocation24_spill] sm:$0xff] %v3758_v40  ;;  %v1028_v47 = vsel %vm1012_vm1, %v3758_v40, 0.0 }
 0x1ba   : > { %1053 = vadd.xlane.f32.xlu0 %v1052_v41  ;;  %1146 = vadd.xlane.f32.xlu1 %v1145_v52  ;;  %v1127_v41 = vsel %vm1012_vm1, %v3763_v30, 0.0  ;;  %v3777_v51 = vpop.permute.xlu1 %410  ;;  %v1034_v52 = vsel %vm1012_vm1, %v3771_v18, 0.0 }
 0x1be   : > { %1059 = vadd.xlane.f32.xlu0 %v1058_v56  ;;  %1152 = vadd.xlane.f32.xlu1 %v1151_v61  ;;  %v1358_v56 = vsel %vm1012_vm1, %v1278_v50, 0.0  ;;  %v3792_v61 = vcombine.high %v3741_v28, %v5663_v25  ;;  %v427_v2 = vpop.permute.xlu1 %426  ;;  %v1314_v50 = vmul.f32 %v3675_v45, %v3675_v45 }
 0x1c0   : > { %5798 = vst [vmem:[#allocation28_spill] sm:$0xff] %v3792_v61  ;;  %v1118_v3 = vsel %vm1012_vm1, %v3792_v61, 0.0 }
 0x1c2   : > { %1137 = vadd.xlane.f32.xlu0 %v1136_v0  ;;  %1026 = vadd.xlane.f32.xlu1 %v1025_v4  ;;  %v1282_v0 = vmul.f32 %v3620_v6, %v3620_v6  ;;  %v3801_v4 = vcombine.high %v3752_v35, %v5663_v25  ;;  %v3806_v36 = vpop.permute.xlu1 %434 }
 0x1c4   : > { %5799 = vst [vmem:[#allocation29_spill] sm:$0xff] %v3801_v4  ;;  %v1370_v8 = vsel %vm1012_vm1, %v1282_v0, 0.0  ;;  %v1124_v12 = vsel %vm1012_vm1, %v3801_v4, 0.0  ;;  %v1316_v0 = vmul.f32 %v3688_v53, %v3688_v53 }
 0x1c6   : > { %1143 = vadd.xlane.f32.xlu0 %v1142_v9  ;;  %1032 = vadd.xlane.f32.xlu1 %v1031_v13  ;;  %v1284_v9 = vmul.f32 %v3635_v14, %v3635_v14  ;;  %v3812_v13 = vcombine.high %v3763_v30, %v5663_v25 }
 0x1c8   : > { %5800 = vst [vmem:[#allocation30_spill] sm:$0xff] %v3812_v13  ;;  %v1376_v19 = vsel %vm1012_vm1, %v1284_v9, 0.0  ;;  %v1130_v24 = vsel %vm1012_vm1, %v3812_v13, 0.0  ;;  %v1285_v9 = vmul.f32 %v3682_v49, %v3682_v49 }
 0x1ca   : > { %1149 = vadd.xlane.f32.xlu0 %v1148_v48  ;;  %1110 = vadd.xlane.f32.xlu1 %v1109_v27  ;;  %v1310_v48 = vmul.f32 %v3648_v29, %v3648_v29  ;;  %v1279_v27 = vmul.f32 %v3642_v26, %v3642_v26 }
 0x1ce   : > { %1155 = vadd.xlane.f32.xlu0 %v1154_v17  ;;  %1116 = vadd.xlane.f32.xlu1 %v1115_v34  ;;  %v1454_v17 = vsel %vm1012_vm1, %v1310_v48, 0.0  ;;  %v451_v34 = vpop.permute.xlu1 %450  ;;  %v1472_v48 = vsel %vm1012_vm1, %v1316_v0, 0.0  ;;  %v1315_v0 = vmul.f32 %v3723_v11, %v3723_v11 }
 0x1d2   : > { %1023 = vadd.xlane.f32.xlu0 %v1022_v39  ;;  %1122 = vadd.xlane.f32.xlu1 %v1121_v43  ;;  %v1361_v39 = vsel %vm1012_vm1, %v1279_v27, 0.0  ;;  %v1281_v43 = vmul.f32 %v3655_v32, %v3655_v32  ;;  %v673_v27 = vcombine.high %v3551_v20, %v427_v2 }
 0x1d6   : > { %1029 = vadd.xlane.f32.xlu0 %v1028_v47  ;;  %1128 = vadd.xlane.f32.xlu1 %v1127_v41  ;;  %v688_v47 = vcombine.low %v3765_v44, %v451_v34  ;;  %v1460_v41 = vsel %vm1012_vm1, %v1312_v33, 0.0  ;;  %v1311_v33 = vmul.f32 %v3696_v57, %v3696_v57 }
 0x1da   : > { %1035 = vadd.xlane.f32.xlu0 %v1034_v52  ;;  %1359 = vadd.xlane.f32.xlu1 %v1358_v56  ;;  %v672_v52 = vcombine.low %v3551_v20, %v427_v2  ;;  %v1367_v56 = vsel %vm1012_vm1, %v1281_v43, 0.0  ;;  %v1457_v20 = vsel %vm1012_vm1, %v1311_v33, 0.0  ;;  %v1313_v2 = vmul.f32 %v3709_v1, %v3709_v1 }
 0x1de   : > { %1113 = vadd.xlane.f32.xlu0 %v1112_v60  ;;  %1365 = vadd.xlane.f32.xlu1 %v1364_v63  ;;  %v696_v60 = vrot.slane %v688_v47, %v3587_v37  ;;  %v1466_v63 = vsel %vm1012_vm1, %v1314_v50, 0.0  ;;  %v459_v47 = vpop.permute.xlu1 %458 }
 0x1e2   : > { %1119 = vadd.xlane.f32.xlu0 %v1118_v3  ;;  %1371 = vadd.xlane.f32.xlu1 %v1370_v8  ;;  %v680_v3 = vrot.slane %v672_v52, %v3587_v37  ;;  %v1373_v8 = vsel %vm1012_vm1, %v1283_v58, 0.0  ;;  %v960_v52 = vcombine.low %v3777_v51, %v459_v47 }
 0x1e4   : > { %v705_v43 = vcombine.high %v680_v3, %v696_v60 }
 0x1e6   : > { %1125 = vadd.xlane.f32.xlu0 %v1124_v12  ;;  %1377 = vadd.xlane.f32.xlu1 %v1376_v19  ;;  %v689_v12 = vcombine.high %v3765_v44, %v451_v34  ;;  %v704_v19 = vcombine.low %v680_v3, %v696_v60  ;;  %v3867_v58 = vrot.slane %v705_v43, %v3594_v46 }
 0x1e7   : > { %v944_v60 = vcombine.low %v3556_v21, %v3806_v36 }
 0x1e8   : > { %v3857_v34 = vrot.slane %v704_v19, %v3594_v46  ;;  %5803 = vst [vmem:[#allocation33_spill] sm:$0xff] %v3867_v58 }
 0x1e9   : > { %v952_v19 = vrot.slane %v944_v60, %v3587_v37 }
 0x1ea   : > { %1131 = vadd.xlane.f32.xlu0 %v1130_v24  ;;  %1455 = vadd.xlane.f32.xlu1 %v1454_v17  ;;  %v3847_v24 = vcombine.high %v3623_v7, %v5663_v25  ;;  %v1379_v17 = vsel %vm1012_vm1, %v1285_v9, 0.0  ;;  %5802 = vst [vmem:[#allocation32_spill] sm:$0xff] %v3857_v34  ;;  %v1091_v9 = vsel %vm1012_vm1, %v3867_v58, 0.0 }
 0x1ec   : > { %5801 = vst [vmem:[#allocation31_spill] sm:$0xff] %v3847_v24  ;;  %v1016_v44 = vsel %vm1012_vm1, %v3847_v24, 0.0 }
 0x1ee   : > { %1362 = vadd.xlane.f32.xlu0 %v1361_v39  ;;  %1461 = vadd.xlane.f32.xlu1 %v1460_v41  ;;  %v703_v39 = vrot.slane %v689_v12, %v3587_v37  ;;  %v687_v41 = vrot.slane %v673_v27, %v3587_v37  ;;  %v1317_v27 = vmul.f32 %v3736_v16, %v3736_v16 }
 0x1f0   : > { %v720_v50 = vcombine.low %v687_v41, %v703_v39  ;;  %v721_v3 = vcombine.high %v687_v41, %v703_v39  ;;  %v1475_v41 = vsel %vm1012_vm1, %v1317_v27, 0.0 }
 0x1f2   : > { %1368 = vadd.xlane.f32.xlu0 %v1367_v56  ;;  %1467 = vadd.xlane.f32.xlu1 %v1466_v63  ;;  %v1085_v56 = vsel %vm1012_vm1, %v3857_v34, 0.0  ;;  %v1463_v63 = vsel %vm1012_vm1, %v1313_v2, 0.0  ;;  %v3878_v12 = vrot.slane %v720_v50, %v3594_v46  ;;  %v3888_v43 = vrot.slane %v721_v3, %v3594_v46 }
 0x1f4   : > { %5804 = vst [vmem:[#allocation34_spill] sm:$0xff] %v3878_v12  ;;  %v1097_v39 = vsel %vm1012_vm1, %v3878_v12, 0.0  ;;  %5805 = vst [vmem:[#allocation35_spill] sm:$0xff] %v3888_v43  ;;  %v1103_v2 = vsel %vm1012_vm1, %v3888_v43, 0.0  ;;  %v3919_v3 = vcombine.high %v3878_v12, %v5663_v25  ;;  %v3930_v27 = vcombine.high %v3888_v43, %v5663_v25 }
 0x1f6   : > { %1374 = vadd.xlane.f32.xlu0 %v1373_v8  ;;  %1473 = vadd.xlane.f32.xlu1 %v1472_v48  ;;  %v968_v8 = vrot.slane %v960_v52, %v3587_v37  ;;  %v1469_v48 = vsel %vm1012_vm1, %v1315_v0, 0.0  ;;  %5810 = vst [vmem:[#allocation40_spill] sm:$0xff] %v3919_v3  ;;  %5812 = vst [vmem:[#allocation42_spill] sm:$0xff] %v3930_v27 }
 0x1f8   : > { %v976_v33 = vcombine.low %v952_v19, %v968_v8 }
 0x1fa   : > { %1380 = vadd.xlane.f32.xlu0 %v1379_v17  ;;  %1017 = vadd.xlane.f32.xlu1 %v1016_v44  ;;  %v961_v17 = vcombine.high %v3777_v51, %v459_v47  ;;  %v945_v44 = vcombine.high %v3556_v21, %v3806_v36  ;;  %v977_v47 = vcombine.high %v952_v19, %v968_v8 }
 0x1fb   : > { %v3901_v50 = vrot.slane %v976_v33, %v3594_v46  ;;  %v3908_v36 = vcombine.high %v3867_v58, %v5663_v25 }
 0x1fc   : > { %v975_v51 = vrot.slane %v961_v17, %v3587_v37  ;;  %v959_v52 = vrot.slane %v945_v44, %v3587_v37  ;;  %v1106_v44 = vsel %vm1012_vm1, %v3930_v27, 0.0 }
 0x1fd   : > { %5807 = vst [vmem:[#allocation37_spill] sm:$0xff] %v3901_v50  ;;  %5808 = vst [vmem:[#allocation38_spill] sm:$0xff] %v3908_v36  ;;  %v1181_v60 = vsel %vm1012_vm1, %v3901_v50, 0.0  ;;  %v1094_v0 = vsel %vm1012_vm1, %v3908_v36, 0.0 }
 0x1fe   : > { %1458 = vadd.xlane.f32.xlu0 %v1457_v20  ;;  %1086 = vadd.xlane.f32.xlu1 %v1085_v56  ;;  %v3895_v20 = vcombine.high %v3857_v34, %v5663_v25  ;;  %v992_v56 = vcombine.low %v959_v52, %v975_v51  ;;  %v993_v8 = vcombine.high %v959_v52, %v975_v51 }
 0x200   : > { %5806 = vst [vmem:[#allocation36_spill] sm:$0xff] %v3895_v20  ;;  %v1088_v21 = vsel %vm1012_vm1, %v3895_v20, 0.0  ;;  %v3924_v19 = vrot.slane %v992_v56, %v3594_v46  ;;  %v3935_v33 = vrot.slane %v993_v8, %v3594_v46 }
 0x202   : > { %1464 = vadd.xlane.f32.xlu0 %v1463_v63  ;;  %1092 = vadd.xlane.f32.xlu1 %v1091_v9  ;;  %v3913_v63 = vrot.slane %v977_v47, %v3594_v46  ;;  %5811 = vst [vmem:[#allocation41_spill] sm:$0xff] %v3924_v19  ;;  %v1193_v17 = vsel %vm1012_vm1, %v3924_v19, 0.0  ;;  %5813 = vst [vmem:[#allocation43_spill] sm:$0xff] %v3935_v33  ;;  %v1199_v51 = vsel %vm1012_vm1, %v3935_v33, 0.0 }
 0x203   : > { %v1270_v47 = vmul.f32 %v3623_v7, %v3623_v7  ;;  %v3964_v8 = vcombine.high %v3924_v19, %v5663_v25 }
 0x204   : > { %5809 = vst [vmem:[#allocation39_spill] sm:$0xff] %v3913_v63  ;;  %v1187_v9 = vsel %vm1012_vm1, %v3913_v63, 0.0 }
 0x205   : > { %v1334_v56 = vsel %vm1012_vm1, %v1270_v47, 0.0  ;;  %5816 = vst [vmem:[#allocation46_spill] sm:$0xff] %v3964_v8 }
 0x206   : > { %1470 = vadd.xlane.f32.xlu0 %v1469_v48  ;;  %1098 = vadd.xlane.f32.xlu1 %v1097_v39  ;;  %v1100_v48 = vsel %vm1012_vm1, %v3919_v3, 0.0  ;;  %v3937_v39 = vpop.permute.xlu0 %408 }
 0x20a   : > { %1476 = vadd.xlane.f32.xlu0 %v1475_v41  ;;  %1104 = vadd.xlane.f32.xlu1 %v1103_v2  ;;  %v3943_v41 = vcombine.high %v3901_v50, %v5663_v25  ;;  %v3949_v2 = vpop.permute.xlu0 %424 }
 0x20c   : > { %5814 = vst [vmem:[#allocation44_spill] sm:$0xff] %v3943_v41  ;;  %v1184_v52 = vsel %vm1012_vm1, %v3943_v41, 0.0 }
 0x20e   : > { %1089 = vadd.xlane.f32.xlu0 %v1088_v21  ;;  %1182 = vadd.xlane.f32.xlu1 %v1181_v60  ;;  %v3955_v21 = vcombine.high %v3913_v63, %v5663_v25  ;;  %v1272_v60 = vmul.f32 %v3629_v10, %v3629_v10 }
 0x210   : > { %5815 = vst [vmem:[#allocation45_spill] sm:$0xff] %v3955_v21 }
 0x212   : > { %1095 = vadd.xlane.f32.xlu0 %v1094_v0  ;;  %1188 = vadd.xlane.f32.xlu1 %v1187_v9  ;;  %v1190_v0 = vsel %vm1012_vm1, %v3955_v21, 0.0  ;;  %v1340_v9 = vsel %vm1012_vm1, %v1272_v60, 0.0 }
 0x216   : > { %1101 = vadd.xlane.f32.xlu0 %v1100_v48  ;;  %1194 = vadd.xlane.f32.xlu1 %v1193_v17  ;;  %v1274_v48 = vmul.f32 %v3702_v62, %v3702_v62  ;;  %v3969_v17 = vpop.permute.xlu0 %432 }
 0x218   : > { %v1346_v47 = vsel %vm1012_vm1, %v1274_v48, 0.0 }
 0x21a   : > { %1107 = vadd.xlane.f32.xlu0 %v1106_v44  ;;  %1200 = vadd.xlane.f32.xlu1 %v1199_v51  ;;  %v1196_v44 = vsel %vm1012_vm1, %v3964_v8, 0.0  ;;  %v3975_v51 = vcombine.high %v3935_v33, %v5663_v25  ;;  %v449_v60 = vpop.permute.xlu0 %448 }
 0x21c   : > { %5817 = vst [vmem:[#allocation47_spill] sm:$0xff] %v3975_v51 }
 0x21e   : > { %1185 = vadd.xlane.f32.xlu0 %v1184_v52  ;;  %1335 = vadd.xlane.f32.xlu1 %v1334_v56  ;;  %v1276_v52 = vmul.f32 %v3715_v5, %v3715_v5  ;;  %v401_v56 = vpop.permute.xlu1 %400 }
 0x21f   : > { %v620_v5 = vcombine.low %v401_v56, %v449_v60  ;;  %v621_v16 = vcombine.high %v401_v56, %v449_v60  ;;  %v1303_v56 = vmul.f32 %v3783_v55, %v3783_v55  ;;  %v1305_v55 = vmul.f32 %v3792_v61, %v3792_v61 }
 0x220   : > { %v1352_v62 = vsel %vm1012_vm1, %v1276_v52, 0.0 }
 0x221   : > { %v635_v60 = vrot.slane %v621_v16, %v3587_v37 }
 0x222   : > { %1191 = vadd.xlane.f32.xlu0 %v1190_v0  ;;  %1341 = vadd.xlane.f32.xlu1 %v1340_v9  ;;  %v1202_v0 = vsel %vm1012_vm1, %v3975_v51, 0.0  ;;  %v1271_v9 = vmul.f32 %v3847_v24, %v3847_v24  ;;  %v3995_v24 = vpop.permute.xlu0 %456 }
 0x224   : > { %v1337_v25 = vsel %vm1012_vm1, %v1271_v9, 0.0 }
 0x226   : > { %1197 = vadd.xlane.f32.xlu0 %v1196_v44  ;;  %1347 = vadd.xlane.f32.xlu1 %v1346_v47  ;;  %v1302_v44 = vmul.f32 %v3729_v15, %v3729_v15  ;;  %v1273_v47 = vmul.f32 %v3747_v31, %v3747_v31  ;;  %v1275_v31 = vmul.f32 %v3758_v40, %v3758_v40 }
 0x227   : > { %v1277_v40 = vmul.f32 %v3771_v18, %v3771_v18 }
 0x228   : > { %v1430_v10 = vsel %vm1012_vm1, %v1302_v44, 0.0  ;;  %v1343_v9 = vsel %vm1012_vm1, %v1273_v47, 0.0  ;;  %v1349_v47 = vsel %vm1012_vm1, %v1275_v31, 0.0 }
 0x229   : > { %v1355_v31 = vsel %vm1012_vm1, %v1277_v40, 0.0  ;;  %v1433_v40 = vsel %vm1012_vm1, %v1303_v56, 0.0  ;;  %v1439_v56 = vsel %vm1012_vm1, %v1305_v55, 0.0 }
 0x22a   : > { %1203 = vadd.xlane.f32.xlu0 %v1202_v0  ;;  %1353 = vadd.xlane.f32.xlu1 %v1352_v62  ;;  %v1304_v0 = vmul.f32 %v3741_v28, %v3741_v28  ;;  %v604_v62 = vcombine.low %v3567_v23, %v3949_v2  ;;  %v1306_v28 = vmul.f32 %v3752_v35, %v3752_v35 }
 0x22b   : > { %v3987_v48 = vpop.xlane.xlu1 %1038 }
 0x22c   : > { %v1436_v44 = vsel %vm1012_vm1, %v1304_v0, 0.0  ;;  %v612_v15 = vrot.slane %v604_v62, %v3587_v37  ;;  %v1442_v0 = vsel %vm1012_vm1, %v1306_v28, 0.0  ;;  %v605_v62 = vcombine.high %v3567_v23, %v3949_v2 }
 0x22e   : > { %1338 = vadd.xlane.f32.xlu0 %v1337_v25  ;;  %1431 = vadd.xlane.f32.xlu1 %v1430_v10  ;;  %v628_v25 = vrot.slane %v620_v5, %v3587_v37  ;;  %v619_v23 = vrot.slane %v605_v62, %v3587_v37  ;;  %v876_v62 = vcombine.low %v3561_v22, %v3969_v17 }
 0x22f   : > { %v3997_v52 = vpop.xlane.xlu1 %1044 }
 0x230   : > { %v636_v5 = vcombine.low %v612_v15, %v628_v25  ;;  %v653_v61 = vcombine.high %v619_v23, %v635_v60 }
 0x232   : > { %1344 = vadd.xlane.f32.xlu0 %v1343_v9  ;;  %1437 = vadd.xlane.f32.xlu1 %v1436_v44  ;;  %v1308_v9 = vmul.f32 %v3763_v30, %v3763_v30  ;;  %v4030_v28 = vrot.slane %v636_v5, %v3594_v46 }
 0x233   : > { %v4008_v10 = vpop.xlane.xlu0 %1014  ;;  %v4011_v7 = vpop.xlane.xlu1 %1050 }
 0x234   : > { %5818 = vst [vmem:[#allocation48_spill] sm:$0xff] %v4008_v10  ;;  %5820 = vst [vmem:[#allocation50_spill] sm:$0xff] %v4030_v28  ;;  %v1061_v5 = vsel %vm1012_vm1, %v4030_v28, 0.0 }
 0x236   : > { %1350 = vadd.xlane.f32.xlu0 %v1349_v47  ;;  %1443 = vadd.xlane.f32.xlu1 %v1442_v0  ;;  %v637_v47 = vcombine.high %v612_v15, %v628_v25  ;;  %v1448_v0 = vsel %vm1012_vm1, %v1308_v9, 0.0  ;;  %v892_v15 = vcombine.low %v3937_v39, %v3995_v24  ;;  %v652_v25 = vcombine.low %v619_v23, %v635_v60 }
 0x237   : > { %v4019_v44 = vpop.xlane.xlu0 %1020  ;;  %v4023_v35 = vpop.xlane.xlu1 %1056  ;;  %v893_v60 = vcombine.high %v3937_v39, %v3995_v24 }
 0x238   : > { %5819 = vst [vmem:[#allocation49_spill] sm:$0xff] %v4019_v44  ;;  %v4044_v16 = vrot.slane %v637_v47, %v3594_v46  ;;  %v900_v47 = vrot.slane %v892_v15, %v3587_v37  ;;  %v884_v44 = vrot.slane %v876_v62, %v3587_v37  ;;  %v1309_v15 = vmul.f32 %v3812_v13, %v3812_v13 }
 0x23a   : > { %1356 = vadd.xlane.f32.xlu0 %v1355_v31  ;;  %1449 = vadd.xlane.f32.xlu1 %v1448_v0  ;;  %5821 = vst [vmem:[#allocation51_spill] sm:$0xff] %v4044_v16  ;;  %v1307_v0 = vmul.f32 %v3801_v4, %v3801_v4  ;;  %v908_v23 = vcombine.low %v884_v44, %v900_v47  ;;  %v1451_v13 = vsel %vm1012_vm1, %v1309_v15, 0.0  ;;  %v5824_v4 = vmov 0.0  }
 0x23b   : > { %v4033_v30 = vpop.xlane.xlu0 %1041  ;;  %v4036_v2 = vpop.xlane.xlu1 %1134  ;;  %v4087_v24 = vcombine.high %v4030_v28, %v5824_v4  ;;  %v909_v39 = vcombine.high %v884_v44, %v900_v47  ;;  %v4104_v44 = vcombine.high %v4044_v16, %v5824_v4 }
 0x23c   : > { %v1445_v55 = vsel %vm1012_vm1, %v1307_v0, 0.0  ;;  %v877_v0 = vcombine.high %v3561_v22, %v3969_v17 }
 0x23d   : > { %5825 = vst [vmem:[#allocation54_spill] sm:$0xff] %v4087_v24  ;;  %v1064_v10 = vsel %vm1012_vm1, %v4087_v24, 0.0  ;;  %5828 = vst [vmem:[#allocation57_spill] sm:$0xff] %v4104_v44  ;;  %v4107_v47 = vrot.slane %v909_v39, %v3594_v46 }
 0x23e   : > { %1434 = vadd.xlane.f32.xlu0 %v1433_v40  ;;  %1062 = vadd.xlane.f32.xlu1 %v1061_v5  ;;  %v4059_v40 = vrot.slane %v652_v25, %v3594_v46  ;;  %v1067_v5 = vsel %vm1012_vm1, %v4044_v16, 0.0  ;;  %v4074_v25 = vrot.slane %v653_v61, %v3594_v46  ;;  %v907_v61 = vrot.slane %v893_v60, %v3587_v37 }
 0x23f   : > { %v4048_v9 = vpop.xlane.xlu0 %1047  ;;  %v4052_v31 = vpop.xlane.xlu1 %1140  ;;  %v891_v17 = vrot.slane %v877_v0, %v3587_v37  ;;  %5829 = vst [vmem:[#allocation58_spill] sm:$0xff] %v4107_v47  ;;  %v1163_v1 = vsel %vm1012_vm1, %v4107_v47, 0.0  ;;  %v4163_v37 = vcombine.high %v4107_v47, %v5824_v4 }
 0x240   : > { %5822 = vst [vmem:[#allocation52_spill] sm:$0xff] %v4059_v40  ;;  %5823 = vst [vmem:[#allocation53_spill] sm:$0xff] %v4074_v25  ;;  %v4134_v57 = vcombine.high %v4074_v25, %v5824_v4 }
 0x241   : > { %v925_v11 = vcombine.high %v891_v17, %v907_v61  ;;  %5840 = vst [vmem:[#allocation69_spill] sm:$0xff] %v4163_v37 }
 0x242   : > { %1440 = vadd.xlane.f32.xlu0 %v1439_v56  ;;  %1068 = vadd.xlane.f32.xlu1 %v1067_v5  ;;  %v1073_v56 = vsel %vm1012_vm1, %v4059_v40, 0.0  ;;  %5834 = vst [vmem:[#allocation63_spill] sm:$0xff] %v4134_v57 }
 0x243   : > { %v4063_v18 = vpop.xlane.xlu0 %1053  ;;  %v4066_v51 = vpop.xlane.xlu1 %1146 }
 0x246   : > { %1446 = vadd.xlane.f32.xlu0 %v1445_v55  ;;  %1074 = vadd.xlane.f32.xlu1 %v1073_v56  ;;  %v4091_v55 = vrot.slane %v908_v23, %v3594_v46  ;;  %v1079_v56 = vsel %vm1012_vm1, %v4074_v25, 0.0 }
 0x247   : > { %v4078_v62 = vpop.xlane.xlu0 %1059  ;;  %v4082_v5 = vpop.xlane.xlu1 %1152 }
 0x248   : > { %5826 = vst [vmem:[#allocation55_spill] sm:$0xff] %v4091_v55  ;;  %v1157_v60 = vsel %vm1012_vm1, %v4091_v55, 0.0 }
 0x24a   : > { %1452 = vadd.xlane.f32.xlu0 %v1451_v13  ;;  %1080 = vadd.xlane.f32.xlu1 %v1079_v56  ;;  %v924_v13 = vcombine.low %v891_v17, %v907_v61  ;;  %v1070_v56 = vsel %vm1012_vm1, %v4104_v44, 0.0  ;;  %v4137_v61 = vrot.slane %v925_v11, %v3594_v46 }
 0x24b   : > { %v4095_v22 = vpop.xlane.xlu0 %1137  ;;  %v4098_v15 = vpop.xlane.xlu1 %1026 }
 0x24c   : > { %5827 = vst [vmem:[#allocation56_spill] sm:$0xff] %v4098_v15  ;;  %v4119_v15 = vcombine.high %v4059_v40, %v5824_v4  ;;  %v4122_v39 = vrot.slane %v924_v13, %v3594_v46  ;;  %5835 = vst [vmem:[#allocation64_spill] sm:$0xff] %v4137_v61  ;;  %v1175_v11 = vsel %vm1012_vm1, %v4137_v61, 0.0  ;;  %v1294_v46 = vmul.f32 %v3857_v34, %v3857_v34 }
 0x24e   : > { %1065 = vadd.xlane.f32.xlu0 %v1064_v10  ;;  %1158 = vadd.xlane.f32.xlu1 %v1157_v60  ;;  %5831 = vst [vmem:[#allocation60_spill] sm:$0xff] %v4119_v15  ;;  %5832 = vst [vmem:[#allocation61_spill] sm:$0xff] %v4122_v39  ;;  %v1169_v17 = vsel %vm1012_vm1, %v4122_v39, 0.0  ;;  %v1406_v49 = vsel %vm1012_vm1, %v1294_v46, 0.0  ;;  %v4179_v33 = vcombine.high %v4122_v39, %v5824_v4 }
 0x24f   : > { %v4111_v23 = vpop.xlane.xlu0 %1143  ;;  %v4113_v0 = vpop.xlane.xlu1 %1032 }
 0x250   : > { %5830 = vst [vmem:[#allocation59_spill] sm:$0xff] %v4113_v0  ;;  %v1076_v0 = vsel %vm1012_vm1, %v4119_v15, 0.0  ;;  %5843 = vst [vmem:[#allocation72_spill] sm:$0xff] %v4179_v33 }
 0x252   : > { %1071 = vadd.xlane.f32.xlu0 %v1070_v56  ;;  %1164 = vadd.xlane.f32.xlu1 %v1163_v1  ;;  %v1082_v56 = vsel %vm1012_vm1, %v4134_v57, 0.0 }
 0x253   : > { %v4126_v10 = vpop.xlane.xlu0 %1149  ;;  %v4128_v60 = vpop.xlane.xlu1 %1110 }
 0x254   : > { %5833 = vst [vmem:[#allocation62_spill] sm:$0xff] %v4128_v60  ;;  %v4149_v60 = vcombine.high %v4091_v55, %v5824_v4 }
 0x256   : > { %1077 = vadd.xlane.f32.xlu0 %v1076_v0  ;;  %1170 = vadd.xlane.f32.xlu1 %v1169_v17  ;;  %5837 = vst [vmem:[#allocation66_spill] sm:$0xff] %v4149_v60 }
 0x257   : > { %v4141_v1 = vpop.xlane.xlu0 %1155  ;;  %v4143_v13 = vpop.xlane.xlu1 %1116 }
 0x258   : > { %5836 = vst [vmem:[#allocation65_spill] sm:$0xff] %v4143_v13  ;;  %v1160_v13 = vsel %vm1012_vm1, %v4149_v60, 0.0 }
 0x25a   : > { %1083 = vadd.xlane.f32.xlu0 %v1082_v56  ;;  %1176 = vadd.xlane.f32.xlu1 %v1175_v11  ;;  %v1296_v56 = vmul.f32 %v3867_v58, %v3867_v58 }
 0x25b   : > { %v4155_v0 = vpop.xlane.xlu0 %1023  ;;  %v4157_v17 = vpop.xlane.xlu1 %1122 }
 0x25c   : > { %5838 = vst [vmem:[#allocation67_spill] sm:$0xff] %v4155_v0  ;;  %5839 = vst [vmem:[#allocation68_spill] sm:$0xff] %v4157_v17  ;;  %v4173_v17 = vmul.f32 0.0625, %v3987_v48  ;;  %v1166_v0 = vsel %vm1012_vm1, %v4163_v37, 0.0  ;;  %v1412_v46 = vsel %vm1012_vm1, %v1296_v56, 0.0  ;;  %v4188_v48 = vcombine.high %v4137_v61, %v5824_v4 }
 0x25e   : > { %1161 = vadd.xlane.f32.xlu0 %v1160_v13  ;;  %1407 = vadd.xlane.f32.xlu1 %v1406_v49  ;;  %v1298_v49 = vmul.f32 %v3878_v12, %v3878_v12  ;;  %5845 = vst [vmem:[#allocation74_spill] sm:$0xff] %v4188_v48  ;;  %v1178_v53 = vsel %vm1012_vm1, %v4188_v48, 0.0 }
 0x25f   : > { %v4168_v34 = vpop.xlane.xlu0 %1029  ;;  %v4170_v11 = vpop.xlane.xlu1 %1128 }
 0x260   : > { %5841 = vst [vmem:[#allocation70_spill] sm:$0xff] %v4168_v34  ;;  %5842 = vst [vmem:[#allocation71_spill] sm:$0xff] %v4170_v11  ;;  %v1598_v11 = vmul.f32 %v4173_v17, %v4173_v17  ;;  %v4193_v34 = vmul.f32 0.0625, %v3997_v52  ;;  %v1418_v56 = vsel %vm1012_vm1, %v1298_v49, 0.0 }
 0x262   : > { %1167 = vadd.xlane.f32.xlu0 %v1166_v0  ;;  %1413 = vadd.xlane.f32.xlu1 %v1412_v46  ;;  %v1172_v0 = vsel %vm1012_vm1, %v4179_v33, 0.0  ;;  %v1300_v46 = vmul.f32 %v3888_v43, %v3888_v43  ;;  %v1600_v52 = vmul.f32 %v4193_v34, %v4193_v34 }
 0x263   : > { %v4184_v13 = vpop.xlane.xlu0 %1035  ;;  %v1360_v58 = vpop.xlane.xlu1 %1359 }
 0x264   : > { %5844 = vst [vmem:[#allocation73_spill] sm:$0xff] %v4184_v13  ;;  %v1534_v37 = vmul.f32 0.0625, %v1360_v58  ;;  %v1295_v58 = vmul.f32 %v3895_v20, %v3895_v20 }
 0x266   : > { %1173 = vadd.xlane.f32.xlu0 %v1172_v0  ;;  %v1662_v12 = vsub.f32 %v1534_v37, %v1598_v11  ;;  %1419 = vadd.xlane.f32.xlu1 %v1418_v56  ;;  %v4209_v0 = vmul.f32 0.0625, %v4011_v7  ;;  %v1424_v37 = vsel %vm1012_vm1, %v1300_v46, 0.0  ;;  %v1326_v11 = vmul.f32 %v3901_v50, %v3901_v50 }
 0x267   : > { %v4200_v4 = vpop.xlane.xlu0 %1113  ;;  %v1366_v13 = vpop.xlane.xlu1 %1365  ;;  %v1297_v56 = vmul.f32 %v3908_v36, %v3908_v36  ;;  %v1409_v7 = vsel %vm1012_vm1, %v1295_v58, 0.0  ;;  %v4226_v46 = vmul.f32 0.0625, %v4023_v35  ;;  %v1330_v58 = vmul.f32 %v3924_v19, %v3924_v19 }
 0x268   : > { %5846 = vst [vmem:[#allocation75_spill] sm:$0xff] %v4200_v4  ;;  %v1792_v49 = vadd.f32 1e-05, %v1662_v12  ;;  %v1536_v33 = vmul.f32 0.0625, %v1366_v13  ;;  %v1328_v12 = vmul.f32 %v3913_v63, %v3913_v63  ;;  %v1602_v13 = vmul.f32 %v4209_v0, %v4209_v0 }
 0x269   : > { %v1301_v36 = vmul.f32 %v3930_v27, %v3930_v27  ;;  %v1286_v35 = vmul.f32 %v4030_v28, %v4030_v28  ;;  %v1514_v28 = vsel %vm1012_vm1, %v1330_v58, 0.0  ;;  %v4264_v58 = vmul.f32 0.0625, %v4052_v31 }
 0x26a   : > { %1179 = vadd.xlane.f32.xlu0 %v1178_v53  ;;  %3082 = vrsqrt.f32 %v1792_v49  ;;  %v1664_v43 = vsub.f32 %v1536_v33, %v1600_v52  ;;  %1425 = vadd.xlane.f32.xlu1 %v1424_v37  ;;  %v1299_v53 = vmul.f32 %v3919_v3, %v3919_v3  ;;  %v1502_v52 = vsel %vm1012_vm1, %v1326_v11, 0.0 }
 0x26b   : > { %v4216_v20 = vpop.xlane.xlu0 %1119  ;;  %v1372_v4 = vpop.xlane.xlu1 %1371  ;;  %v1415_v37 = vsel %vm1012_vm1, %v1297_v56, 0.0  ;;  %v1327_v56 = vmul.f32 %v3943_v41, %v3943_v41 }
 0x26c   : > { %v1794_v49 = vadd.f32 1e-05, %v1664_v43  ;;  %v1538_v33 = vmul.f32 0.0625, %v1372_v4  ;;  %v1508_v4 = vsel %vm1012_vm1, %v1328_v12, 0.0  ;;  %v1421_v11 = vsel %vm1012_vm1, %v1299_v53, 0.0 }
 0x26d   : > { %v1329_v12 = vmul.f32 %v3955_v21, %v3955_v21  ;;  %v1290_v53 = vmul.f32 %v4059_v40, %v4059_v40  ;;  %v1505_v40 = vsel %vm1012_vm1, %v1327_v56, 0.0  ;;  %v4283_v56 = vmul.f32 %v4087_v24, %v4087_v24 }
 0x26e   : > { %1410 = vadd.xlane.f32.xlu0 %v1409_v7  ;;  %3084 = vrsqrt.f32 %v1794_v49  ;;  %v1666_v63 = vsub.f32 %v1538_v33, %v1602_v13  ;;  %1503 = vadd.xlane.f32.xlu1 %v1502_v52  ;;  %v1288_v7 = vmul.f32 %v4044_v16, %v4044_v16  ;;  %v1604_v13 = vmul.f32 %v4226_v46, %v4226_v46 }
 0x26f   : > { %v4232_v3 = vpop.xlane.xlu0 %1125  ;;  %v1378_v43 = vpop.xlane.xlu1 %1377  ;;  %v4247_v49 = vmul.f32 0.0625, %v4036_v2  ;;  %v1331_v16 = vmul.f32 %v3964_v8, %v3964_v8  ;;  %v1382_v2 = vsel %vm1012_vm1, %v1286_v35, 0.0  ;;  %v4276_v31 = vsel %vm1012_vm1, %v1290_v53, 0.0 }
 0x270   : > { %v1796_v33 = vadd.f32 1e-05, %v1666_v63  ;;  %v1540_v52 = vmul.f32 0.0625, %v1378_v43  ;;  %v1427_v63 = vsel %vm1012_vm1, %v1301_v36, 0.0  ;;  %v1388_v36 = vsel %vm1012_vm1, %v1288_v7, 0.0 }
 0x271   : > { %v4279_v35 = vsel %vm1012_vm1, %v1331_v16, 0.0  ;;  %v1632_v16 = vmul.f32 %v4264_v58, %v4264_v58 }
 0x272   : > { %1416 = vadd.xlane.f32.xlu0 %v1415_v37  ;;  %3086 = vrsqrt.f32 %v1796_v33  ;;  %v1668_v41 = vsub.f32 %v1540_v52, %v1604_v13  ;;  %1509 = vadd.xlane.f32.xlu1 %v1508_v4  ;;  %v4261_v37 = vmul.f32 0.0625, %v4033_v30  ;;  %v1292_v33 = vmul.f32 %v4074_v25, %v4074_v25 }
 0x273   : > { %v4256_v27 = vpop.xlane.xlu0 %1131  ;;  %v1456_v43 = vpop.xlane.xlu1 %1455  ;;  %v1630_v4 = vmul.f32 %v4247_v49, %v4247_v49  ;;  %v4273_v30 = vsel %vm1012_vm1, %v1329_v12, 0.0 }
 0x274   : > { %v1798_v13 = vadd.f32 1e-05, %v1668_v41  ;;  %v1566_v52 = vmul.f32 0.0625, %v1456_v43  ;;  %v1728_v41 = vsub.f32 %v3603_v54, %v4173_v17  ;;  %v4288_v43 = vmul.f32 0.0625, %v4048_v9 }
 0x275   : > { %v1599_v53 = vmul.f32 %v4261_v37, %v4261_v37  ;;  %v4295_v8 = vsel %vm1012_vm1, %v1292_v33, 0.0  ;;  %v4298_v54 = vmul.f32 0.0625, %v4066_v51  ;;  %v4310_v33 = vmul.f32 %v4091_v55, %v4091_v55 }
 0x276   : > { %1422 = vadd.xlane.f32.xlu0 %v1421_v11  ;;  %3088 = vrsqrt.f32 %v1798_v13  ;;  %v1694_v11 = vsub.f32 %v1566_v52, %v1630_v4  ;;  %1515 = vadd.xlane.f32.xlu1 %v1514_v28  ;;  %v4303_v28 = vld [vmem:[%s5657_s2] ss:$0 sm:$0xff]  ;;  %v4306_v13 = vmul.f32 0.0625, %v4063_v18  ;;  %v4314_v51 = vmul.f32 %v4104_v44, %v4104_v44 }
 0x277   : > { %v1363_v7 = vpop.xlane.xlu0 %1362  ;;  %v3083_v12 = vpop.eup %3082  ;;  %v1634_v55 = vmul.f32 %v4298_v54, %v4298_v54 }
 0x278   : > { %v1535_v25 = vmul.f32 0.0625, %v1363_v7  ;;  %v1462_v24 = vpop.xlane.xlu1 %1461  ;;  %v1920_v9 = vmul.f32 %v3083_v12, %v1728_v41  ;;  %v1824_v17 = vadd.f32 1e-05, %v1694_v11  ;;  %v1601_v41 = vmul.f32 %v4288_v43, %v4288_v43 }
 0x279   : > { %v1568_v4 = vmul.f32 0.0625, %v1462_v24  ;;  %v1730_v24 = vsub.f32 %v3610_v59, %v4193_v34 }
 0x27a   : > { %v1663_v52 = vsub.f32 %v1535_v25, %v1599_v53  ;;  %1428 = vadd.xlane.f32.xlu0 %v1427_v63  ;;  %3090 = vrsqrt.f32 %v1824_v17  ;;  %1383 = vadd.xlane.f32.xlu1 %v1382_v2  ;;  %v4321_v63 = vmul.f32 0.0625, %v4082_v5  ;;  %v1990_v44 = vmul.f32 %v4303_v28, %v1920_v9  ;;  %v4329_v2 = vld [vmem:[%s5658_s3] ss:$0 sm:$0xff] }
 0x27b   : > { %v1696_v11 = vsub.f32 %v1568_v4, %v1632_v16  ;;  %v1369_v18 = vpop.xlane.xlu0 %1368  ;;  %v3085_v25 = vpop.eup %3084  ;;  %v1732_v5 = vsub.f32 %v3620_v6, %v4209_v0  ;;  %v1603_v16 = vmul.f32 %v4306_v13, %v4306_v13  ;;  %v4336_v9 = vmul.f32 0.0625, %v4078_v62 }
 0x27c   : > { %v1793_v7 = vadd.f32 1e-05, %v1663_v52  ;;  %v1537_v12 = vmul.f32 0.0625, %v1369_v18  ;;  %v1468_v53 = vpop.xlane.xlu1 %1467  ;;  %v1922_v59 = vmul.f32 %v3085_v25, %v1730_v24  ;;  %v1636_v18 = vmul.f32 %v4321_v63, %v4321_v63 }
 0x27d   : > { %v1826_v34 = vadd.f32 1e-05, %v1696_v11  ;;  %v1570_v21 = vmul.f32 0.0625, %v1468_v53 }
 0x27e   : > { %3092 = vrsqrt.f32 %v1793_v7  ;;  %v1665_v17 = vsub.f32 %v1537_v12, %v1601_v41  ;;  %1506 = vadd.xlane.f32.xlu0 %v1505_v40  ;;  %1389 = vadd.xlane.f32.xlu1 %v1388_v36  ;;  %v1992_v24 = vmul.f32 %v4303_v28, %v1922_v59  ;;  %v4342_v7 = vadd.f32 %v4329_v2, %v1990_v44 }
 0x27f   : > { %3094 = vrsqrt.f32 %v1826_v34  ;;  %v1698_v4 = vsub.f32 %v1570_v21, %v1634_v55  ;;  %v1375_v52 = vpop.xlane.xlu0 %1374  ;;  %v3087_v11 = vpop.eup %3086  ;;  %v1385_v55 = vsel %vm1012_vm1, %v4283_v56, 0.0  ;;  %v1320_v36 = vmul.f32 %v4107_v47, %v4107_v47 }
 0x280   : > { %v1795_v6 = vadd.f32 1e-05, %v1665_v17  ;;  %v1539_v0 = vmul.f32 0.0625, %v1375_v52  ;;  %v1474_v25 = vpop.xlane.xlu1 %1473  ;;  %v1924_v40 = vmul.f32 %v3087_v11, %v1732_v5  ;;  %v4345_v12 = vadd.f32 %v4329_v2, %v1992_v24 }
 0x281   : > { %v1828_v41 = vadd.f32 1e-05, %v1698_v4  ;;  %v1572_v62 = vmul.f32 0.0625, %v1474_v25  ;;  %v1734_v44 = vsub.f32 %v3635_v14, %v4226_v46  ;;  %v4360_v56 = vmul.f32 0.0625, %v4095_v22 }
 0x282   : > { %3096 = vrsqrt.f32 %v1795_v6  ;;  %v1667_v21 = vsub.f32 %v1539_v0, %v1603_v16  ;;  %1512 = vadd.xlane.f32.xlu0 %v4273_v30  ;;  %1395 = vadd.xlane.f32.xlu1 %v4276_v31  ;;  %v2184_v34 = vcombine.low %v4342_v7, %v4345_v12  ;;  %v1605_v30 = vmul.f32 %v4336_v9, %v4336_v9 }
 0x283   : > { %3098 = vrsqrt.f32 %v1828_v41  ;;  %v1700_v53 = vsub.f32 %v1572_v62, %v1636_v18  ;;  %v1381_v59 = vpop.xlane.xlu0 %1380  ;;  %v3089_v5 = vpop.eup %3088  ;;  %v1291_v31 = vmul.f32 %v4119_v15, %v4119_v15  ;;  %v1994_v52 = vmul.f32 %v4303_v28, %v1924_v40 }
 0x284   : > { %v1797_v16 = vadd.f32 1e-05, %v1667_v21  ;;  %v1541_v17 = vmul.f32 0.0625, %v1381_v59  ;;  %v4362_v4 = vpop.xlane.xlu1 %1017  ;;  %v1926_v14 = vmul.f32 %v3089_v5, %v1734_v44  ;;  %v1322_v11 = vmul.f32 %v4122_v39, %v4122_v39 }
 0x285   : > { %v1830_v46 = vadd.f32 1e-05, %v1700_v53  ;;  %v1293_v22 = vmul.f32 %v4134_v57, %v4134_v57  ;;  %v1760_v18 = vsub.f32 %v3648_v29, %v4247_v49  ;;  %v4375_v6 = vmul.f32 0.0625, %v4111_v23  ;;  %v5876_v57 = vld [vmem:[#allocation73_spill] sm:$0xff] }
 0x286   : > { %3100 = vrsqrt.f32 %v1797_v16  ;;  %v1669_v24 = vsub.f32 %v1541_v17, %v1605_v30  ;;  %1518 = vadd.xlane.f32.xlu0 %v4279_v35  ;;  %1401 = vadd.xlane.f32.xlu1 %v4295_v8  ;;  %v1996_v25 = vmul.f32 %v4303_v28, %v1926_v14  ;;  %v1631_v35 = vmul.f32 %v4360_v56, %v4360_v56 }
 0x287   : > { %3102 = vrsqrt.f32 %v1830_v46  ;;  %v1459_v0 = vpop.xlane.xlu0 %1458  ;;  %v3091_v40 = vpop.eup %3090  ;;  %v1478_v29 = vsel %vm1012_vm1, %v4310_v33, 0.0  ;;  %v1391_v23 = vsel %vm1012_vm1, %v4314_v51, 0.0  ;;  %v4388_v8 = vadd.f32 %v4329_v2, %v1994_v52 }
 0x288   : > { %v1799_v41 = vadd.f32 1e-05, %v1669_v24  ;;  %v1567_v62 = vmul.f32 0.0625, %v1459_v0  ;;  %v4381_v21 = vpop.xlane.xlu1 %1086  ;;  %v1952_v49 = vmul.f32 %v3091_v40, %v1760_v18  ;;  %v4391_v44 = vadd.f32 %v4329_v2, %v1996_v25 }
 0x289   : > { %v1729_v53 = vsub.f32 %v3642_v26, %v4261_v37  ;;  %v1484_v5 = vsel %vm1012_vm1, %v1320_v36, 0.0  ;;  %v1762_v33 = vsub.f32 %v3661_v38, %v4264_v58  ;;  %v1633_v51 = vmul.f32 %v4375_v6, %v4375_v6 }
 0x28a   : > { %3104 = vrsqrt.f32 %v1799_v41  ;;  %v1695_v59 = vsub.f32 %v1567_v62, %v1631_v35  ;;  %1386 = vadd.xlane.f32.xlu0 %v1385_v55  ;;  %1479 = vadd.xlane.f32.xlu1 %v1478_v29  ;;  %v1324_v17 = vmul.f32 %v4137_v61, %v4137_v61  ;;  %v2200_v26 = vcombine.low %v4388_v8, %v4391_v44  ;;  %v5857_v44 = vld [vmem:[#allocation47_spill] sm:$0xff] }
 0x28b   : > { %v3093_v30 = vpop.eup %3092  ;;  %v1465_v16 = vpop.xlane.xlu0 %1464  ;;  %v4405_v55 = vmul.f32 0.0625, %v4126_v10  ;;  %v1397_v58 = vsel %vm1012_vm1, %v1291_v31, 0.0  ;;  %v1490_v24 = vsel %vm1012_vm1, %v1322_v11, 0.0  ;;  %v2022_v18 = vmul.f32 %v4303_v28, %v1952_v49 }
 0x28c   : > { %v3095_v37 = vpop.eup %3094  ;;  %v1921_v36 = vmul.f32 %v3093_v30, %v1729_v53  ;;  %v1825_v14 = vadd.f32 1e-05, %v1695_v59  ;;  %v1569_v46 = vmul.f32 0.0625, %v1465_v16  ;;  %v4407_v52 = vpop.xlane.xlu1 %1092  ;;  %v1731_v0 = vsub.f32 %v3655_v32, %v4288_v43 }
 0x28d   : > { %v1954_v38 = vmul.f32 %v3095_v37, %v1762_v33  ;;  %v1403_v10 = vsel %vm1012_vm1, %v1293_v22, 0.0  ;;  %v1764_v35 = vsub.f32 %v3675_v45, %v4298_v54  ;;  %v4418_v41 = vmul.f32 0.0625, %v4141_v1 }
 0x28e   : > { %3106 = vrsqrt.f32 %v1825_v14  ;;  %v1697_v25 = vsub.f32 %v1569_v46, %v1633_v51  ;;  %1392 = vadd.xlane.f32.xlu0 %v1391_v23  ;;  %1485 = vadd.xlane.f32.xlu1 %v1484_v5  ;;  %v1991_v62 = vmul.f32 %v4303_v28, %v1921_v36  ;;  %v1635_v32 = vmul.f32 %v4405_v55, %v4405_v55  ;;  %v5847_v51 = vld [vmem:[#allocation13_spill] sm:$0xff] }
 0x28f   : > { %v3097_v40 = vpop.eup %3096  ;;  %v1471_v31 = vpop.xlane.xlu0 %1470  ;;  %v2024_v11 = vmul.f32 %v4303_v28, %v1954_v38  ;;  %v1319_v45 = vmul.f32 %v4149_v60, %v4149_v60  ;;  %v4429_v1 = vadd.f32 %v4329_v2, %v2022_v18  ;;  %v1733_v59 = vsub.f32 %v3669_v42, %v4306_v13 }
 0x290   : > { %v3099_v29 = vpop.eup %3098  ;;  %v1923_v43 = vmul.f32 %v3097_v40, %v1731_v0  ;;  %v1827_v49 = vadd.f32 1e-05, %v1697_v25  ;;  %v1571_v22 = vmul.f32 0.0625, %v1471_v31  ;;  %v4424_v23 = vpop.xlane.xlu1 %1098  ;;  %v1766_v16 = vsub.f32 %v5847_v51, %v4321_v63  ;;  %v5848_v40 = vld [vmem:[#allocation43_spill] sm:$0xff]  ;;  %v5849_v31 = vld [vmem:[#allocation12_spill] sm:$0xff] }
 0x291   : > { %v1956_v53 = vmul.f32 %v3099_v29, %v1764_v35  ;;  %v4432_v54 = vadd.f32 %v4329_v2, %v2024_v11  ;;  %v1637_v37 = vmul.f32 %v4418_v41, %v4418_v41  ;;  %v2061_v46 = vadd.f32 %v4329_v2, %v1991_v62  ;;  %v5851_v51 = vld [vmem:[#allocation8_spill] sm:$0xff] }
 0x292   : > { %3108 = vrsqrt.f32 %v1827_v49  ;;  %v1699_v5 = vsub.f32 %v1571_v22, %v1635_v32  ;;  %1398 = vadd.xlane.f32.xlu0 %v1397_v58  ;;  %v1993_v30 = vmul.f32 %v4303_v28, %v1923_v43  ;;  %1491 = vadd.xlane.f32.xlu1 %v1490_v24  ;;  %v1496_v63 = vsel %vm1012_vm1, %v1324_v17, 0.0  ;;  %v5850_v49 = vld [vmem:[#allocation69_spill] sm:$0xff] }
 0x293   : > { %v3101_v33 = vpop.eup %3100  ;;  %v1477_v36 = vpop.xlane.xlu0 %1476  ;;  %v2456_v14 = vcombine.low %v4429_v1, %v4432_v54  ;;  %v1332_v24 = vmul.f32 %v5848_v40, %v5848_v40  ;;  %v2026_v35 = vmul.f32 %v4303_v28, %v1956_v53  ;;  %v1735_v11 = vsub.f32 %v5849_v31, %v4336_v9  ;;  %v5854_v31 = vld [vmem:[#allocation16_spill] sm:$0xff] }
 0x294   : > { %v3103_v42 = vpop.eup %3102  ;;  %v1925_v13 = vmul.f32 %v3101_v33, %v1733_v59  ;;  %v1829_v38 = vadd.f32 1e-05, %v1699_v5  ;;  %v1573_v58 = vmul.f32 0.0625, %v1477_v36  ;;  %v4444_v18 = vpop.xlane.xlu1 %1104  ;;  %v2063_v0 = vadd.f32 %v4329_v2, %v1993_v30  ;;  %v5852_v36 = vld [vmem:[#allocation14_spill] sm:$0xff] }
 0x295   : > { %v1958_v25 = vmul.f32 %v3103_v42, %v1766_v16  ;;  %v1321_v22 = vmul.f32 %v5850_v49, %v5850_v49  ;;  %v1481_v53 = vsel %vm1012_vm1, %v1319_v45, 0.0  ;;  %v2191_v16 = vrot.slane %v2184_v34, %v5851_v51 }
 0x296   : > { %3110 = vrsqrt.f32 %v1829_v38  ;;  %v1701_v62 = vsub.f32 %v1573_v58, %v1637_v37  ;;  %1404 = vadd.xlane.f32.xlu0 %v1403_v10  ;;  %v2192_v29 = vcombine.low %v2061_v46, %v2063_v0  ;;  %1497 = vadd.xlane.f32.xlu1 %v1496_v63  ;;  %v1995_v9 = vmul.f32 %v4303_v28, %v1925_v13 }
 0x297   : > { %v3105_v32 = vpop.eup %3104  ;;  %v4453_v43 = vpop.xlane.xlu0 %1089  ;;  %v2028_v17 = vmul.f32 %v4303_v28, %v1958_v25  ;;  %v4463_v10 = vadd.f32 %v4329_v2, %v2026_v35  ;;  %v1761_v46 = vsub.f32 %v5852_v36, %v4360_v56  ;;  %v1520_v45 = vsel %vm1012_vm1, %v1332_v24, 0.0  ;;  %v5853_v24 = vld [vmem:[#allocation72_spill] sm:$0xff] }
 0x298   : > { %v1927_v59 = vmul.f32 %v3105_v32, %v1735_v11  ;;  %v1831_v5 = vadd.f32 1e-05, %v1701_v62  ;;  %v4458_v30 = vpop.xlane.xlu1 %1182  ;;  %v2199_v37 = vrot.slane %v2192_v29, %v5851_v51  ;;  %v2065_v0 = vadd.f32 %v4329_v2, %v1995_v9 }
 0x299   : > { %v4466_v33 = vadd.f32 %v4329_v2, %v2028_v17  ;;  %v1487_v63 = vsel %vm1012_vm1, %v1321_v22, 0.0  ;;  %v1323_v35 = vmul.f32 %v5853_v24, %v5853_v24  ;;  %v1763_v11 = vsub.f32 %v5854_v31, %v4375_v6 }
 0x29a   : > { %3112 = vrsqrt.f32 %v1831_v5  ;;  %1482 = vadd.xlane.f32.xlu0 %v1481_v53  ;;  %v1997_v42 = vmul.f32 %v4303_v28, %v1927_v59  ;;  %1521 = vadd.xlane.f32.xlu1 %v1520_v45  ;;  %v2217_v7 = vcombine.high %v2191_v16, %v2199_v37  ;;  %v2216_v25 = vcombine.low %v2191_v16, %v2199_v37  ;;  %v5855_v16 = vld [vmem:[#allocation18_spill] sm:$0xff] }
 0x29b   : > { %v3107_v13 = vpop.eup %3106  ;;  %v4477_v38 = vpop.xlane.xlu0 %1095  ;;  %v2472_v58 = vcombine.low %v4463_v10, %v4466_v33  ;;  %v2207_v22 = vrot.slane %v2200_v26, %v5851_v51  ;;  %v1493_v9 = vsel %vm1012_vm1, %v1323_v35, 0.0  ;;  %v1325_v6 = vmul.f32 %v4188_v48, %v4188_v48  ;;  %v5858_v35 = vld [vmem:[#allocation9_spill] sm:$0xff]  ;;  %v5870_v48 = vld [vmem:[#allocation10_spill] sm:$0xff] }
 0x29c   : > { %v1953_v12 = vmul.f32 %v3107_v13, %v1761_v46  ;;  %v4481_v34 = vpop.xlane.xlu1 %1188  ;;  %v2067_v56 = vadd.f32 %v4329_v2, %v1997_v42  ;;  %v1765_v37 = vsub.f32 %v5855_v16, %v4405_v55  ;;  %v5856_v42 = vld [vmem:[#allocation48_spill] sm:$0xff]  ;;  %v1333_v26 = vmul.f32 %v5857_v44, %v5857_v44 }
 0x29d   : > { %v4507_v13 = vmul.f32 0.0625, %v5856_v42  ;;  %v4639_v39 = vmul.f32 0.0625, %v5876_v57 }
 0x29e   : > { %1488 = vadd.xlane.f32.xlu0 %v1487_v63  ;;  %v2208_v62 = vcombine.low %v2065_v0, %v2067_v56  ;;  %v2023_v5 = vmul.f32 %v4303_v28, %v1953_v12 }
 0x29f   : > { %v3109_v29 = vpop.eup %3108  ;;  %v4490_v32 = vpop.xlane.xlu0 %1101  ;;  %v1590_v16 = vmul.f32 %v4507_v13, %v4507_v13 }
 0x2a0   : > { %v1955_v17 = vmul.f32 %v3109_v29, %v1763_v11  ;;  %v4492_v59 = vpop.xlane.xlu1 %1194  ;;  %v2215_v53 = vrot.slane %v2208_v62, %v5851_v51  ;;  %v2093_v63 = vadd.f32 %v4329_v2, %v2023_v5  ;;  %v1499_v11 = vsel %vm1012_vm1, %v1325_v6, 0.0 }
 0x2a1   : > { %v4522_v62 = vrot.slane %v2217_v7, %v5858_v35  ;;  %v4525_v29 = vrot.slane %v2216_v25, %v5858_v35  ;;  %v1523_v7 = vsel %vm1012_vm1, %v1333_v26, 0.0 }
 0x2a2   : > { %1494 = vadd.xlane.f32.xlu0 %v1493_v9  ;;  %v2025_v36 = vmul.f32 %v4303_v28, %v1955_v17  ;;  %v2233_v46 = vcombine.high %v2207_v22, %v2215_v53  ;;  %v2232_v12 = vcombine.low %v2207_v22, %v2215_v53  ;;  %v5861_v22 = vld [vmem:[#allocation20_spill] sm:$0xff] }
 0x2a3   : > { %v3111_v45 = vpop.eup %3110  ;;  %v4509_v8 = vpop.xlane.xlu0 %1107  ;;  %5859 = vst [vmem:[#allocation13_spill] sm:$0xff] %v4525_v29  ;;  %v1767_v53 = vsub.f32 %v5861_v22, %v4418_v41 }
 0x2a4   : > { %v1957_v0 = vmul.f32 %v3111_v45, %v1765_v37  ;;  %v4513_v56 = vpop.xlane.xlu1 %1200  ;;  %v2095_v55 = vadd.f32 %v4329_v2, %v2025_v36  ;;  %v4518_v31 = vrot.slane %v2233_v46, %v5858_v35  ;;  %v4528_v17 = vrot.slane %v2232_v12, %v5858_v35  ;;  %v5862_v12 = vld [vmem:[#allocation49_spill] sm:$0xff] }
 0x2a5   : > { %v2463_v45 = vrot.slane %v2456_v14, %v5851_v51 }
 0x2a6   : > { %5860 = vst [vmem:[#allocation12_spill] sm:$0xff] %v4528_v17  ;;  %1500 = vadd.xlane.f32.xlu0 %v1499_v11  ;;  %v2464_v5 = vcombine.low %v2093_v63, %v2095_v55  ;;  %v2027_v41 = vmul.f32 %v4303_v28, %v1957_v0  ;;  %v4548_v63 = vmul.f32 0.0625, %v5862_v12  ;;  %v5863_v12 = vld [vmem:[#allocation56_spill] sm:$0xff] }
 0x2a7   : > { %v3113_v9 = vpop.eup %3112  ;;  %v4534_v37 = vpop.xlane.xlu0 %1185  ;;  %v4562_v55 = vmul.f32 0.0625, %v5863_v12 }
 0x2a8   : > { %v1959_v36 = vmul.f32 %v3113_v9, %v1767_v53  ;;  %v1336_v46 = vpop.xlane.xlu1 %1335  ;;  %v2471_v42 = vrot.slane %v2464_v5, %v5851_v51  ;;  %v2097_v14 = vadd.f32 %v4329_v2, %v2027_v41  ;;  %v2479_v41 = vrot.slane %v2472_v58, %v5851_v51 }
 0x2a9   : > { %v1526_v26 = vmul.f32 0.0625, %v1336_v46  ;;  %v1592_v46 = vmul.f32 %v4548_v63, %v4548_v63 }
 0x2aa   : > { %1524 = vadd.xlane.f32.xlu0 %v1523_v7  ;;  %v2029_v0 = vmul.f32 %v4303_v28, %v1959_v36  ;;  %v2488_v22 = vcombine.low %v2463_v45, %v2471_v42  ;;  %v2489_v1 = vcombine.high %v2463_v45, %v2471_v42  ;;  %v1594_v42 = vmul.f32 %v4562_v55, %v4562_v55 }
 0x2ab   : > { %v1654_v53 = vsub.f32 %v1526_v26, %v1590_v16  ;;  %v4555_v9 = vpop.xlane.xlu0 %1191 }
 0x2ac   : > { %v1342_v54 = vpop.xlane.xlu1 %1341  ;;  %v2099_v5 = vadd.f32 %v4329_v2, %v2029_v0  ;;  %v5864_v0 = vld [vmem:[#allocation59_spill] sm:$0xff]  ;;  %v4582_v33 = vrot.slane %v2488_v22, %v5858_v35 }
 0x2ad   : > { %v1784_v11 = vadd.f32 1e-05, %v1654_v53  ;;  %v1528_v7 = vmul.f32 0.0625, %v1342_v54  ;;  %v4574_v12 = vmul.f32 0.0625, %v5864_v0  ;;  %v5868_v0 = vld [vmem:[#allocation65_spill] sm:$0xff] }
 0x2ae   : > { %v2480_v6 = vcombine.low %v2097_v14, %v2099_v5  ;;  %v4577_v5 = vmul.f32 0.0625, %v4362_v4  ;;  %5865 = vst [vmem:[#allocation14_spill] sm:$0xff] %v4582_v33  ;;  %v4599_v22 = vmul.f32 0.0625, %v5868_v0 }
 0x2af   : > { %3114 = vrsqrt.f32 %v1784_v11  ;;  %v1656_v36 = vsub.f32 %v1528_v7, %v1592_v46  ;;  %v4564_v16 = vpop.xlane.xlu0 %1197  ;;  %v1596_v4 = vmul.f32 %v4574_v12, %v4574_v12 }
 0x2b0   : > { %v1348_v26 = vpop.xlane.xlu1 %1347  ;;  %v2487_v45 = vrot.slane %v2480_v6, %v5851_v51  ;;  %v4588_v6 = vrot.slane %v2489_v1, %v5858_v35  ;;  %v1591_v0 = vmul.f32 %v4577_v5, %v4577_v5 }
 0x2b1   : > { %v1786_v53 = vadd.f32 1e-05, %v1656_v36  ;;  %v1530_v54 = vmul.f32 0.0625, %v1348_v26  ;;  %v5867_v26 = vld [vmem:[#allocation62_spill] sm:$0xff] }
 0x2b2   : > { %v2504_v11 = vcombine.low %v2479_v41, %v2487_v45  ;;  %v2505_v14 = vcombine.high %v2479_v41, %v2487_v45  ;;  %v4596_v41 = vmul.f32 0.0625, %v5867_v26  ;;  %v1720_v26 = vsub.f32 %v5870_v48, %v4507_v13  ;;  %v5873_v13 = vld [vmem:[#allocation68_spill] sm:$0xff] }
 0x2b3   : > { %3116 = vrsqrt.f32 %v1786_v53  ;;  %v1658_v46 = vsub.f32 %v1530_v54, %v1594_v42  ;;  %v4579_v7 = vpop.xlane.xlu0 %1203  ;;  %v5872_v48 = vcombine.low %v4522_v62, %v4518_v31 }
 0x2b4   : > { %v1354_v10 = vpop.xlane.xlu1 %1353  ;;  %v4585_v58 = vrot.slane %v2504_v11, %v5858_v35  ;;  %v4591_v36 = vrot.slane %v2505_v14, %v5858_v35 }
 0x2b5   : > { %v1788_v45 = vadd.f32 1e-05, %v1658_v46  ;;  %v1532_v42 = vmul.f32 0.0625, %v1354_v10  ;;  %v5869_v46 = vld [vmem:[#allocation67_spill] sm:$0xff] }
 0x2b6   : > { %5866 = vst [vmem:[#allocation16_spill] sm:$0xff] %v4585_v58  ;;  %v2521_v53 = vcombine.high %v4582_v33, %v4585_v58  ;;  %v2522_v1 = vcombine.low %v4588_v6, %v4591_v36  ;;  %v4610_v10 = vmul.f32 0.0625, %v5869_v46  ;;  %v1624_v46 = vmul.f32 %v4599_v22, %v4599_v22 }
 0x2b7   : > { %3118 = vrsqrt.f32 %v1788_v45  ;;  %v1660_v54 = vsub.f32 %v1532_v42, %v1596_v4  ;;  %v1339_v11 = vpop.xlane.xlu0 %1338  ;;  %v1622_v4 = vmul.f32 %v4596_v41, %v4596_v41 }
 0x2b8   : > { %v1527_v25 = vmul.f32 0.0625, %v1339_v11  ;;  %v1432_v44 = vpop.xlane.xlu1 %1431  ;;  %2678 = vrot.lane.b32.xlu1 %v2521_v53, %s3315_s29  ;;  %v1593_v24 = vmul.f32 %v4610_v10, %v4610_v10  ;;  %v5871_v53 = vld [vmem:[#allocation70_spill] sm:$0xff] }
 0x2b9   : > { %v1790_v45 = vadd.f32 1e-05, %v1660_v54  ;;  %v1558_v42 = vmul.f32 0.0625, %v1432_v44  ;;  %v4624_v49 = vmul.f32 0.0625, %v5871_v53 }
 0x2ba   : > { %v1655_v14 = vsub.f32 %v1527_v25, %v1591_v0  ;;  %v4631_v25 = vmul.f32 0.0625, %v5873_v13  ;;  %v5878_v13 = vld [vmem:[#allocation15_spill] sm:$0xff] }
 0x2bb   : > { %3120 = vrsqrt.f32 %v1790_v45  ;;  %v1686_v58 = vsub.f32 %v1558_v42, %v1622_v4  ;;  %v1345_v33 = vpop.xlane.xlu0 %1344  ;;  %v5874_v42 = vld [vmem:[#allocation71_spill] sm:$0xff] }
 0x2bc   : > { %v3115_v11 = vpop.eup %3114  ;;  %v1785_v60 = vadd.f32 1e-05, %v1655_v14  ;;  %v1529_v54 = vmul.f32 0.0625, %v1345_v33  ;;  %v1438_v44 = vpop.xlane.xlu1 %1437  ;;  %2702 = vrot.lane.b32.xlu1 %v5872_v48, %s3316_s30  ;;  %v4634_v61 = vmul.f32 0.0625, %v5874_v42  ;;  %v5875_v33 = vld [vmem:[#allocation11_spill] sm:$0xff] }
 0x2bd   : > { %v1912_v0 = vmul.f32 %v3115_v11, %v1720_v26  ;;  %v1816_v4 = vadd.f32 1e-05, %v1686_v58  ;;  %v1560_v45 = vmul.f32 0.0625, %v1438_v44  ;;  %v1722_v14 = vsub.f32 %v5875_v33, %v4548_v63 }
 0x2be   : > { %3122 = vrsqrt.f32 %v1785_v60  ;;  %v1657_v53 = vsub.f32 %v1529_v54, %v1593_v24  ;;  %v1595_v26 = vmul.f32 %v4624_v49, %v4624_v49  ;;  %v5877_v60 = vcombine.high %v4525_v29, %v4528_v17 }
 0x2bf   : > { %3124 = vrsqrt.f32 %v1816_v4  ;;  %v1688_v15 = vsub.f32 %v1560_v45, %v1624_v46  ;;  %v1351_v48 = vpop.xlane.xlu0 %1350  ;;  %v1982_v57 = vmul.f32 %v4303_v28, %v1912_v0  ;;  %v1626_v24 = vmul.f32 %v4631_v25, %v4631_v25 }
 0x2c0   : > { %v3117_v47 = vpop.eup %3116  ;;  %v1787_v58 = vadd.f32 1e-05, %v1657_v53  ;;  %v1531_v11 = vmul.f32 0.0625, %v1351_v48  ;;  %v1444_v44 = vpop.xlane.xlu1 %1443  ;;  %2670 = vrot.lane.b32.xlu0 %v5877_v60, %s3315_s29  ;;  %2710 = vrot.lane.b32.xlu1 %v2522_v1, %s3316_s30  ;;  %v1724_v4 = vsub.f32 %v5878_v13, %v4562_v55  ;;  %v1628_v45 = vmul.f32 %v4634_v61, %v4634_v61 }
 0x2c1   : > { %v1914_v63 = vmul.f32 %v3117_v47, %v1722_v14  ;;  %v1818_v46 = vadd.f32 1e-05, %v1688_v15  ;;  %v1562_v54 = vmul.f32 0.0625, %v1444_v44  ;;  %v1597_v53 = vmul.f32 %v4639_v39, %v4639_v39  ;;  %v5879_v47 = vld [vmem:[#allocation75_spill] sm:$0xff] }
 0x2c2   : > { %3126 = vrsqrt.f32 %v1787_v58  ;;  %v1659_v42 = vsub.f32 %v1531_v11, %v1595_v26  ;;  %v4659_v15 = vmul.f32 0.0625, %v5879_v47  ;;  %v5880_v26 = vcombine.high %v4522_v62, %v4518_v31  ;;  %v5883_v47 = vld [vmem:[#allocation31_spill] sm:$0xff] }
 0x2c3   : > { %3128 = vrsqrt.f32 %v1818_v46  ;;  %v1690_v1 = vsub.f32 %v1562_v54, %v1626_v24  ;;  %v1357_v0 = vpop.xlane.xlu0 %1356  ;;  %v1984_v33 = vmul.f32 %v4303_v28, %v1914_v63  ;;  %v4666_v58 = vadd.f32 %v4329_v2, %v1982_v57  ;;  %v5881_v46 = vld [vmem:[#allocation17_spill] sm:$0xff] }
 0x2c4   : > { %v3119_v48 = vpop.eup %3118  ;;  %v1789_v14 = vadd.f32 1e-05, %v1659_v42  ;;  %v1533_v44 = vmul.f32 0.0625, %v1357_v0  ;;  %v1450_v55 = vpop.xlane.xlu1 %1449  ;;  %2734 = vrot.lane.b32.xlu1 %v5880_v26, %s3317_s5  ;;  %v1726_v54 = vsub.f32 %v5881_v46, %v4574_v12  ;;  %v4674_v42 = vmul.f32 0.0625, %v4216_v20  ;;  %v5884_v26 = vld [vmem:[#allocation19_spill] sm:$0xff] }
 0x2c5   : > { %v1916_v11 = vmul.f32 %v3119_v48, %v1724_v4  ;;  %v1820_v60 = vadd.f32 1e-05, %v1690_v1  ;;  %v1564_v24 = vmul.f32 0.0625, %v1450_v55  ;;  %v4669_v63 = vadd.f32 %v4329_v2, %v1984_v33 }
 0x2c6   : > { %3130 = vrsqrt.f32 %v1789_v14  ;;  %v1661_v13 = vsub.f32 %v1533_v44, %v1597_v53  ;;  %v1623_v1 = vmul.f32 %v4659_v15, %v4659_v15  ;;  %v5882_v12 = vcombine.high %v4588_v6, %v4591_v36 }
 0x2c7   : > { %3132 = vrsqrt.f32 %v1820_v60  ;;  %v1692_v31 = vsub.f32 %v1564_v24, %v1628_v45  ;;  %v1435_v62 = vpop.xlane.xlu0 %1434  ;;  %v2116_v57 = vcombine.low %v4666_v58, %v4669_v63  ;;  %v1986_v45 = vmul.f32 %v4303_v28, %v1916_v11 }
 0x2c8   : > { %v3121_v4 = vpop.eup %3120  ;;  %v1791_v0 = vadd.f32 1e-05, %v1661_v13  ;;  %v1559_v33 = vmul.f32 0.0625, %v1435_v62  ;;  %v4680_v48 = vpop.xlane.xlu1 %1062  ;;  %2742 = vrot.lane.b32.xlu1 %v5882_v12, %s3317_s5  ;;  %v1721_v14 = vsub.f32 %v5883_v47, %v4577_v5  ;;  %v1752_v60 = vsub.f32 %v5884_v26, %v4596_v41 }
 0x2c9   : > { %v1918_v20 = vmul.f32 %v3121_v4, %v1726_v54  ;;  %v1822_v53 = vadd.f32 1e-05, %v1692_v31  ;;  %v1625_v24 = vmul.f32 %v4674_v42, %v4674_v42  ;;  %v4695_v54 = vmul.f32 0.0625, %v4232_v3  ;;  %v5886_v3 = vld [vmem:[#allocation21_spill] sm:$0xff] }
 0x2ca   : > { %3134 = vrsqrt.f32 %v1791_v0  ;;  %v1687_v44 = vsub.f32 %v1559_v33, %v1623_v1  ;;  %v4700_v4 = vadd.f32 %v4329_v2, %v1986_v45  ;;  %v5885_v1 = vld [vmem:[#allocation22_spill] sm:$0xff] }
 0x2cb   : > { %v3123_v55 = vpop.eup %3122  ;;  %3136 = vrsqrt.f32 %v1822_v53  ;;  %v1441_v46 = vpop.xlane.xlu0 %1440  ;;  %v1988_v6 = vmul.f32 %v4303_v28, %v1918_v20  ;;  %v1723_v0 = vsub.f32 %v5885_v1, %v4610_v10  ;;  %v1754_v20 = vsub.f32 %v5886_v3, %v4599_v22 }
 0x2cc   : > { %v3125_v36 = vpop.eup %3124  ;;  %v1913_v11 = vmul.f32 %v3123_v55, %v1721_v14  ;;  %v1817_v13 = vadd.f32 1e-05, %v1687_v44  ;;  %v1561_v5 = vmul.f32 0.0625, %v1441_v46  ;;  %v4697_v31 = vpop.xlane.xlu1 %1068  ;;  %v4710_v53 = vmul.f32 0.0625, %v4256_v27  ;;  %v5887_v27 = vld [vmem:[#allocation24_spill] sm:$0xff] }
 0x2cd   : > { %v1944_v62 = vmul.f32 %v3125_v36, %v1752_v60  ;;  %v4703_v41 = vadd.f32 %v4329_v2, %v1988_v6  ;;  %v1627_v55 = vmul.f32 %v4695_v54, %v4695_v54  ;;  %v1725_v6 = vsub.f32 %v5887_v27, %v4624_v49 }
 0x2ce   : > { %3138 = vrsqrt.f32 %v1817_v13  ;;  %v1689_v33 = vsub.f32 %v1561_v5, %v1625_v24  ;;  %v1983_v14 = vmul.f32 %v4303_v28, %v1913_v11  ;;  %v5888_v5 = vld [vmem:[#allocation23_spill] sm:$0xff] }
 0x2cf   : > { %v3127_v12 = vpop.eup %3126  ;;  %v1447_v47 = vpop.xlane.xlu0 %1446  ;;  %v2132_v45 = vcombine.low %v4700_v4, %v4703_v41  ;;  %v2014_v22 = vmul.f32 %v4303_v28, %v1944_v62  ;;  %v1756_v1 = vsub.f32 %v5888_v5, %v4631_v25 }
 0x2d0   : > { %v3129_v44 = vpop.eup %3128  ;;  %v1915_v10 = vmul.f32 %v3127_v12, %v1723_v0  ;;  %v1819_v26 = vadd.f32 1e-05, %v1689_v33  ;;  %v1563_v60 = vmul.f32 0.0625, %v1447_v47  ;;  %v4717_v24 = vpop.xlane.xlu1 %1074  ;;  %v1629_v0 = vmul.f32 %v4710_v53, %v4710_v53 }
 0x2d1   : > { %v1946_v46 = vmul.f32 %v3129_v44, %v1754_v20  ;;  %v2053_v12 = vadd.f32 %v4329_v2, %v1983_v14 }
 0x2d2   : > { %3140 = vrsqrt.f32 %v1819_v26  ;;  %v1691_v36 = vsub.f32 %v1563_v60, %v1627_v55  ;;  %v1985_v11 = vmul.f32 %v4303_v28, %v1915_v10  ;;  %v4733_v26 = vadd.f32 %v4329_v2, %v2014_v22  ;;  %v5889_v60 = vld [vmem:[#allocation26_spill] sm:$0xff] }
 0x2d3   : > { %v3131_v13 = vpop.eup %3130  ;;  %v1453_v33 = vpop.xlane.xlu0 %1452  ;;  %v2016_v3 = vmul.f32 %v4303_v28, %v1946_v46  ;;  %v1727_v14 = vsub.f32 %v5889_v60, %v4639_v39 }
 0x2d4   : > { %v3133_v62 = vpop.eup %3132  ;;  %v1917_v20 = vmul.f32 %v3131_v13, %v1725_v6  ;;  %v1821_v47 = vadd.f32 1e-05, %v1691_v36  ;;  %v1565_v49 = vmul.f32 0.0625, %v1453_v33  ;;  %v4729_v44 = vpop.xlane.xlu1 %1080  ;;  %v2055_v55 = vadd.f32 %v4329_v2, %v1985_v11  ;;  %v5890_v36 = vld [vmem:[#allocation25_spill] sm:$0xff] }
 0x2d5   : > { %v1948_v10 = vmul.f32 %v3133_v62, %v1756_v1  ;;  %v4736_v25 = vadd.f32 %v4329_v2, %v2016_v3  ;;  %v1758_v13 = vsub.f32 %v5890_v36, %v4634_v61 }
 0x2d6   : > { %3142 = vrsqrt.f32 %v1821_v47  ;;  %v1693_v46 = vsub.f32 %v1565_v49, %v1629_v0  ;;  %v2124_v27 = vcombine.low %v2053_v12, %v2055_v55  ;;  %v1987_v62 = vmul.f32 %v4303_v28, %v1917_v20  ;;  %v5891_v55 = vld [vmem:[#allocation27_spill] sm:$0xff] }
 0x2d7   : > { %v3135_v6 = vpop.eup %3134  ;;  %v4742_v5 = vpop.xlane.xlu0 %1065  ;;  %v2388_v11 = vcombine.low %v4733_v26, %v4736_v25  ;;  %v2123_v0 = vrot.slane %v2116_v57, %v5851_v51  ;;  %v2018_v12 = vmul.f32 %v4303_v28, %v1948_v10  ;;  %v1753_v60 = vsub.f32 %v5891_v55, %v4659_v15  ;;  %v5892_v15 = vld [vmem:[#allocation28_spill] sm:$0xff] }
 0x2d8   : > { %v3137_v22 = vpop.eup %3136  ;;  %v1919_v1 = vmul.f32 %v3135_v6, %v1727_v14  ;;  %v1823_v33 = vadd.f32 1e-05, %v1693_v46  ;;  %v4746_v3 = vpop.xlane.xlu1 %1158  ;;  %v2131_v61 = vrot.slane %v2124_v27, %v5851_v51  ;;  %v2057_v58 = vadd.f32 %v4329_v2, %v1987_v62 }
 0x2d9   : > { %v1950_v39 = vmul.f32 %v3137_v22, %v1758_v13  ;;  %v4766_v10 = vadd.f32 %v4329_v2, %v2018_v12  ;;  %v1755_v13 = vsub.f32 %v5892_v15, %v4674_v42  ;;  %v2139_v12 = vrot.slane %v2132_v45, %v5851_v51  ;;  %v5893_v42 = vld [vmem:[#allocation29_spill] sm:$0xff] }
 0x2da   : > { %3144 = vrsqrt.f32 %v1823_v33  ;;  %v1989_v47 = vmul.f32 %v4303_v28, %v1919_v1  ;;  %v2148_v20 = vcombine.low %v2123_v0, %v2131_v61  ;;  %v2149_v36 = vcombine.high %v2123_v0, %v2131_v61 }
 0x2db   : > { %v3139_v49 = vpop.eup %3138  ;;  %v4758_v14 = vpop.xlane.xlu0 %1071  ;;  %v2020_v46 = vmul.f32 %v4303_v28, %v1950_v39  ;;  %v4852_v25 = vmul.f32 0.0625, %v4458_v30  ;;  %v4868_v62 = vmul.f32 0.0625, %v4481_v34  ;;  %v4905_v34 = vmul.f32 0.0625, %v4492_v59 }
 0x2dc   : > { %v4761_v6 = vpop.xlane.xlu1 %1164  ;;  %v2059_v63 = vadd.f32 %v4329_v2, %v1989_v47  ;;  %v1945_v57 = vmul.f32 %v3139_v49, %v1753_v60  ;;  %v1757_v49 = vsub.f32 %v5893_v42, %v4695_v54  ;;  %v4796_v41 = vrot.slane %v2148_v20, %v5858_v35 }
 0x2dd   : > { %v4769_v27 = vadd.f32 %v4329_v2, %v2020_v46  ;;  %5900 = vst [vmem:[#allocation20_spill] sm:$0xff] %v4852_v25  ;;  %5903 = vst [vmem:[#allocation56_spill] sm:$0xff] %v4868_v62 }
 0x2de   : > { %v2140_v22 = vcombine.low %v2057_v58, %v2059_v63  ;;  %v2015_v61 = vmul.f32 %v4303_v28, %v1945_v57  ;;  %v4789_v58 = vmul.f32 0.0625, %v4381_v21  ;;  %5894 = vst [vmem:[#allocation18_spill] sm:$0xff] %v4796_v41  ;;  %5909 = vst [vmem:[#allocation62_spill] sm:$0xff] %v4905_v34 }
 0x2df   : > { %v3141_v1 = vpop.eup %3140  ;;  %v4773_v33 = vpop.xlane.xlu0 %1077  ;;  %v5908_v26 = vcombine.low %v4766_v10, %v4769_v27 }
 0x2e0   : > { %v1947_v39 = vmul.f32 %v3141_v1, %v1755_v13  ;;  %v4777_v47 = vpop.xlane.xlu1 %1170  ;;  %v2147_v0 = vrot.slane %v2140_v22, %v5851_v51  ;;  %v2085_v57 = vadd.f32 %v4329_v2, %v2015_v61  ;;  %v4804_v22 = vrot.slane %v2149_v36, %v5858_v35  ;;  %v5896_v1 = vld [vmem:[#allocation30_spill] sm:$0xff] }
 0x2e1   : > { %v4818_v42 = vmul.f32 %v4789_v58, %v4789_v58  ;;  %v2411_v29 = vrot.slane %v5908_v26, %v5851_v51  ;;  %v5911_v26 = vld [vmem:[#allocation40_spill] sm:$0xff] }
 0x2e2   : > { %v2164_v55 = vcombine.low %v2139_v12, %v2147_v0  ;;  %v2017_v60 = vmul.f32 %v4303_v28, %v1947_v39  ;;  %v2165_v15 = vcombine.high %v2139_v12, %v2147_v0  ;;  %v1759_v39 = vsub.f32 %v5896_v1, %v4710_v53  ;;  %v5898_v1 = vld [vmem:[#allocation32_spill] sm:$0xff] }
 0x2e3   : > { %v3143_v46 = vpop.eup %3142  ;;  %v4791_v63 = vpop.xlane.xlu0 %1083  ;;  %v4812_v12 = vmul.f32 0.0625, %v4407_v52 }
 0x2e4   : > { %v1949_v13 = vmul.f32 %v3143_v46, %v1757_v49  ;;  %v4793_v4 = vpop.xlane.xlu1 %1176  ;;  %v4799_v45 = vrot.slane %v2164_v55, %v5858_v35  ;;  %v2087_v54 = vadd.f32 %v4329_v2, %v2017_v60  ;;  %v4807_v21 = vrot.slane %v2165_v15, %v5858_v35 }
 0x2e5   : > { %v4825_v55 = vmul.f32 0.0625, %v4424_v23  ;;  %v4832_v15 = vmul.f32 0.0625, %v4444_v18  ;;  %v4859_v46 = vmul.f32 0.0625, %v4477_v38 }
 0x2e6   : > { %5895 = vst [vmem:[#allocation48_spill] sm:$0xff] %v4799_v45  ;;  %v2181_v20 = vcombine.high %v4796_v41, %v4799_v45  ;;  %v2396_v36 = vcombine.low %v2085_v57, %v2087_v54  ;;  %v2019_v60 = vmul.f32 %v4303_v28, %v1949_v13  ;;  %v2395_v54 = vrot.slane %v2388_v11, %v5851_v51 }
 0x2e7   : > { %v3145_v0 = vpop.eup %3144  ;;  %v4820_v61 = vpop.xlane.xlu0 %1161  ;;  %5897 = vst [vmem:[#allocation9_spill] sm:$0xff] %v4832_v15  ;;  %v1616_v13 = vmul.f32 %v4812_v12, %v4812_v12  ;;  %5901 = vst [vmem:[#allocation49_spill] sm:$0xff] %v4859_v46  ;;  %v1620_v30 = vmul.f32 %v4832_v15, %v4832_v15  ;;  %v4883_v41 = vmul.f32 %v4852_v25, %v4852_v25 }
 0x2e8   : > { %v1951_v53 = vmul.f32 %v3145_v0, %v1759_v39  ;;  %v1408_v52 = vpop.xlane.xlu1 %1407  ;;  %2668 = vrot.lane.b32.xlu1 %v2181_v20, %s3315_s29  ;;  %v2403_v23 = vrot.slane %v2396_v36, %v5851_v51  ;;  %v4846_v20 = vmul.f32 0.0625, %v4453_v43  ;;  %v5899_v0 = vld [vmem:[#allocation33_spill] sm:$0xff]  ;;  %v1618_v39 = vmul.f32 %v4825_v55, %v4825_v55 }
 0x2e9   : > { %v2089_v49 = vadd.f32 %v4329_v2, %v2019_v60  ;;  %v4877_v60 = vmul.f32 0.0625, %v4490_v32  ;;  %v4891_v17 = vmul.f32 %v4859_v46, %v4859_v46 }
 0x2ea   : > { %v2021_v18 = vmul.f32 %v4303_v28, %v1951_v53  ;;  %v2420_v36 = vcombine.low %v2395_v54, %v2403_v23  ;;  %v2421_v57 = vcombine.high %v2395_v54, %v2403_v23  ;;  %v5902_v53 = vld [vmem:[#allocation34_spill] sm:$0xff]  ;;  %v5904_v23 = vld [vmem:[#allocation35_spill] sm:$0xff]  ;;  %v4874_v38 = vmul.f32 %v4846_v20, %v4846_v20 }
 0x2eb   : > { %v4854_v11 = vpop.xlane.xlu0 %1167  ;;  %v4911_v46 = vmul.f32 %v4877_v60, %v4877_v60 }
 0x2ec   : > { %v1414_v43 = vpop.xlane.xlu1 %1413  ;;  %v2091_v28 = vadd.f32 %v4329_v2, %v2021_v18  ;;  %v5905_v18 = vld [vmem:[#allocation36_spill] sm:$0xff] }
 0x2ed   : > { %v1552_v54 = vmul.f32 0.0625, %v1414_v43  ;;  %v1550_v43 = vmul.f32 0.0625, %v1408_v52  ;;  %v4902_v52 = vmul.f32 %v4868_v62, %v4868_v62 }
 0x2ee   : > { %v2412_v2 = vcombine.low %v2089_v49, %v2091_v28 }
 0x2ef   : > { %v4887_v45 = vpop.xlane.xlu0 %1173  ;;  %v1680_v25 = vsub.f32 %v1552_v54, %v1616_v13  ;;  %v1678_v59 = vsub.f32 %v1550_v43, %v4818_v42  ;;  %v4922_v13 = vrot.slane %v2420_v36, %v5858_v35  ;;  %v4938_v42 = vmul.f32 0.0625, %v4513_v56 }
 0x2f0   : > { %5906 = vst [vmem:[#allocation59_spill] sm:$0xff] %v4887_v45  ;;  %v1420_v28 = vpop.xlane.xlu1 %1419  ;;  %v2419_v15 = vrot.slane %v2412_v2, %v5851_v51  ;;  %v4916_v51 = vmul.f32 0.0625, %v4509_v8  ;;  %v4935_v8 = vmul.f32 %v4905_v34, %v4905_v34 }
 0x2f1   : > { %v1554_v50 = vmul.f32 0.0625, %v1420_v28  ;;  %5913 = vst [vmem:[#allocation67_spill] sm:$0xff] %v4922_v13  ;;  %5915 = vst [vmem:[#allocation70_spill] sm:$0xff] %v4938_v42  ;;  %v1810_v36 = vadd.f32 1e-05, %v1680_v25  ;;  %v4986_v25 = vmul.f32 0.0625, %v4697_v31 }
 0x2f2   : > { %v2436_v10 = vcombine.low %v2411_v29, %v2419_v15  ;;  %v2437_v27 = vcombine.high %v2411_v29, %v2419_v15  ;;  %v4928_v29 = vrot.slane %v2421_v57, %v5858_v35 }
 0x2f3   : > { %v4919_v32 = vpop.xlane.xlu0 %1179  ;;  %v1682_v54 = vsub.f32 %v1554_v50, %v1618_v39  ;;  %v4943_v39 = vmul.f32 0.0625, %v4534_v37  ;;  %v5917_v37 = vld [vmem:[#allocation42_spill] sm:$0xff]  ;;  %3146 = vrsqrt.f32 %v1810_v36 }
 0x2f4   : > { %5912 = vst [vmem:[#allocation65_spill] sm:$0xff] %v4919_v32  ;;  %v1426_v28 = vpop.xlane.xlu1 %1425  ;;  %v4925_v49 = vrot.slane %v2436_v10, %v5858_v35  ;;  %v4931_v15 = vrot.slane %v2437_v27, %v5858_v35  ;;  %v1808_v27 = vadd.f32 1e-05, %v1678_v59  ;;  %v4965_v59 = vmul.f32 0.0625, %v4555_v9 }
 0x2f5   : > { %v1556_v43 = vmul.f32 0.0625, %v1426_v28  ;;  %5916 = vst [vmem:[#allocation68_spill] sm:$0xff] %v4943_v39  ;;  %v4955_v28 = vmul.f32 %v4916_v51, %v4916_v51  ;;  %v1812_v34 = vadd.f32 1e-05, %v1682_v54  ;;  %v4971_v50 = vmul.f32 %v4943_v39, %v4943_v39 }
 0x2f6   : > { %5914 = vst [vmem:[#allocation10_spill] sm:$0xff] %v4925_v49  ;;  %v2453_v57 = vcombine.high %v4922_v13, %v4925_v49  ;;  %v2454_v10 = vcombine.low %v4928_v29, %v4931_v15  ;;  %5918 = vst [vmem:[#allocation71_spill] sm:$0xff] %v4965_v59  ;;  %v4980_v9 = vmul.f32 0.0625, %v4579_v7  ;;  %3148 = vrsqrt.f32 %v1808_v27 }
 0x2f7   : > { %v1684_v2 = vsub.f32 %v1556_v43, %v1620_v30  ;;  %v1411_v62 = vpop.xlane.xlu0 %1410  ;;  %v4962_v30 = vmul.f32 %v4938_v42, %v4938_v42  ;;  %3150 = vrsqrt.f32 %v1812_v34  ;;  %v4994_v7 = vmul.f32 %v4965_v59, %v4965_v59 }
 0x2f8   : > { %v1551_v19 = vmul.f32 0.0625, %v1411_v62  ;;  %v1504_v45 = vpop.xlane.xlu1 %1503  ;;  %2676 = vrot.lane.b32.xlu0 %v2453_v57, %s3315_s29  ;;  %v4974_v62 = vmul.f32 0.0625, %v4564_v16  ;;  %5921 = vst [vmem:[#allocation73_spill] sm:$0xff] %v4980_v9  ;;  %v4999_v27 = vmul.f32 0.0625, %v4717_v24  ;;  %v5006_v34 = vmul.f32 0.0625, %v4729_v44  ;;  %v5928_v44 = vld [vmem:[#allocation50_spill] sm:$0xff] }
 0x2f9   : > { %v1814_v43 = vadd.f32 1e-05, %v1684_v2  ;;  %v4983_v2 = vmul.f32 0.0625, %v4680_v48  ;;  %v5013_v56 = vmul.f32 %v4980_v9, %v4980_v9  ;;  %v5929_v9 = vld [vmem:[#allocation51_spill] sm:$0xff]  ;;  %v5039_v42 = vmul.f32 0.0625, %v4758_v14 }
 0x2fa   : > { %5919 = vst [vmem:[#allocation11_spill] sm:$0xff] %v4974_v62  ;;  %v1679_v54 = vsub.f32 %v1551_v19, %v4874_v38  ;;  %v5922_v19 = vcombine.low %v4804_v22, %v4807_v21  ;;  %v5003_v31 = vmul.f32 %v4974_v62, %v4974_v62  ;;  %v5045_v40 = vmul.f32 %v5006_v34, %v5006_v34  ;;  %v5933_v62 = vld [vmem:[#allocation53_spill] sm:$0xff] }
 0x2fb   : > { %v1417_v36 = vpop.xlane.xlu0 %1416  ;;  %3152 = vrsqrt.f32 %v1814_v43  ;;  %5926 = vst [vmem:[#allocation75_spill] sm:$0xff] %v5013_v56  ;;  %v1606_v24 = vmul.f32 %v4983_v2, %v4983_v2  ;;  %v5018_v43 = vmul.f32 0.0625, %v4742_v5  ;;  %v5033_v5 = vmul.f32 %v4999_v27, %v4999_v27  ;;  %5931 = vst [vmem:[#allocation19_spill] sm:$0xff] %v5039_v42 }
 0x2fc   : > { %v1809_v49 = vadd.f32 1e-05, %v1679_v54  ;;  %v1553_v16 = vmul.f32 0.0625, %v1417_v36  ;;  %v1510_v13 = vpop.xlane.xlu1 %1509  ;;  %2700 = vrot.lane.b32.xlu0 %v5922_v19, %s3316_s30  ;;  %5924 = vst [vmem:[#allocation15_spill] sm:$0xff] %v5003_v31  ;;  %v5036_v36 = vmul.f32 0.0625, %v4746_v3  ;;  %v5057_v59 = vmul.f32 0.0625, %v4761_v6 }
 0x2fd   : > { %5927 = vst [vmem:[#allocation17_spill] sm:$0xff] %v5018_v43  ;;  %v5052_v3 = vmul.f32 %v5018_v43, %v5018_v43  ;;  %v5060_v48 = vmul.f32 0.0625, %v4773_v33  ;;  %v5936_v39 = vcombine.high %v4804_v22, %v4807_v21  ;;  %v5074_v33 = vmul.f32 %v5039_v42, %v5039_v42 }
 0x2fe   : > { %3154 = vrsqrt.f32 %v1809_v49  ;;  %v1681_v54 = vsub.f32 %v1553_v16, %v4891_v17  ;;  %v5024_v17 = vmul.f32 %v4986_v25, %v4986_v25  ;;  %5930 = vst [vmem:[#allocation31_spill] sm:$0xff] %v5036_v36  ;;  %5935 = vst [vmem:[#allocation22_spill] sm:$0xff] %v5057_v59  ;;  %v5068_v32 = vmul.f32 %v5036_v36, %v5036_v36 }
 0x2ff   : > { %v1423_v38 = vpop.xlane.xlu0 %1422  ;;  %v1584_v31 = vmul.f32 0.0625, %v1510_v13  ;;  %v5084_v43 = vmul.f32 %v5057_v59, %v5057_v59  ;;  %v5095_v13 = vmul.f32 0.0625, %v4791_v63  ;;  %v5942_v59 = vsub.f32 %v5899_v0, %v4812_v12 }
 0x300   : > { %v1811_v49 = vadd.f32 1e-05, %v1681_v54  ;;  %v1555_v16 = vmul.f32 0.0625, %v1423_v38  ;;  %v5026_v19 = vpop.xlane.xlu1 %1515  ;;  %2708 = vrot.lane.b32.xlu0 %v2454_v10, %s3316_s30  ;;  %v5932_v54 = vld [vmem:[#allocation52_spill] sm:$0xff]  ;;  %v5943_v12 = vsub.f32 %v5898_v1, %v4789_v58  ;;  %v5945_v58 = vsub.f32 %v5905_v18, %v4846_v20  ;;  %v5947_v20 = vld [vmem:[#allocation9_spill] sm:$0xff] }
 0x301   : > { %v5948_v18 = vsub.f32 %v5904_v23, %v5947_v20  ;;  %v5950_v23 = vld [vmem:[#allocation49_spill] sm:$0xff] }
 0x302   : > { %3156 = vrsqrt.f32 %v1811_v49  ;;  %v1683_v10 = vsub.f32 %v1555_v16, %v4911_v46  ;;  %v1582_v49 = vmul.f32 0.0625, %v1504_v45 }
 0x303   : > { %v1429_v38 = vpop.xlane.xlu0 %1428 }
 0x304   : > { %v1813_v56 = vadd.f32 1e-05, %v1683_v10  ;;  %v1557_v46 = vmul.f32 0.0625, %v1429_v38  ;;  %v1384_v16 = vpop.xlane.xlu1 %1383  ;;  %2732 = vrot.lane.b32.xlu0 %v5936_v39, %s3317_s5  ;;  %v3147_v10 = vpop.eup %3146  ;;  %v5077_v38 = vmul.f32 0.0625, %v4777_v47  ;;  %v5092_v47 = vmul.f32 %v5060_v48, %v5060_v48 }
 0x305   : > { %v1542_v45 = vmul.f32 0.0625, %v1384_v16  ;;  %v3149_v14 = vpop.eup %3148  ;;  %v5940_v39 = vcombine.high %v4928_v29, %v4931_v15  ;;  %v1938_v57 = vmul.f32 %v3147_v10, %v5942_v59  ;;  %v1712_v29 = vsub.f32 %v1584_v31, %v4902_v52  ;;  %v5944_v10 = vld [vmem:[#allocation61_spill] sm:$0xff] }
 0x306   : > { %3158 = vrsqrt.f32 %v1813_v56  ;;  %v1685_v22 = vsub.f32 %v1557_v46, %v4955_v28  ;;  %v1710_v56 = vsub.f32 %v1582_v49, %v4883_v41  ;;  %v5109_v41 = vmul.f32 %v5077_v38, %v5077_v38 }
 0x307   : > { %v1670_v6 = vsub.f32 %v1542_v45, %v1606_v24  ;;  %v5088_v16 = vpop.xlane.xlu0 %1506  ;;  %v3151_v24 = vpop.eup %3150  ;;  %v5941_v45 = vld [vmem:[#allocation60_spill] sm:$0xff]  ;;  %v5112_v49 = vmul.f32 0.0625, %v4793_v4  ;;  %v1936_v0 = vmul.f32 %v3149_v14, %v5943_v12  ;;  %v5128_v52 = vmul.f32 %v5095_v13, %v5095_v13 }
 0x308   : > { %v1815_v28 = vadd.f32 1e-05, %v1685_v22  ;;  %v1390_v46 = vpop.xlane.xlu1 %1389  ;;  %2740 = vrot.lane.b32.xlu0 %v5940_v39, %s3317_s5  ;;  %v3153_v21 = vpop.eup %3152  ;;  %v5116_v22 = vmul.f32 0.0625, %v4820_v61  ;;  %v5131_v31 = vmul.f32 0.0625, %v4854_v11  ;;  %v1840_v61 = vadd.f32 1e-05, %v1710_v56 }
 0x309   : > { %v1800_v42 = vadd.f32 1e-05, %v1670_v6  ;;  %v1544_v63 = vmul.f32 0.0625, %v1390_v46  ;;  %v5139_v14 = vld [vmem:[%s5657_s2] ss:$0 sm:$0xff]  ;;  %v5144_v46 = vmul.f32 %v5112_v49, %v5112_v49  ;;  %v5946_v11 = vsub.f32 %v5902_v53, %v4825_v55  ;;  %v5949_v53 = vld [vmem:[#allocation38_spill] sm:$0xff] }
 0x30a   : > { %3160 = vrsqrt.f32 %v1815_v28  ;;  %v2008_v28 = vmul.f32 %v5139_v14, %v1938_v57  ;;  %v5162_v55 = vmul.f32 %v5131_v31, %v5131_v31 }
 0x30b   : > { %v3155_v15 = vpop.eup %3154  ;;  %3162 = vrsqrt.f32 %v1800_v42  ;;  %v1672_v59 = vsub.f32 %v1544_v63, %v5024_v17  ;;  %v5122_v6 = vpop.xlane.xlu0 %1512  ;;  %v1940_v56 = vmul.f32 %v3151_v24, %v5946_v11  ;;  %v1942_v63 = vmul.f32 %v3153_v21, %v5948_v18 }
 0x30c   : > { %v1396_v39 = vpop.xlane.xlu1 %1395  ;;  %v1937_v1 = vmul.f32 %v3155_v15, %v5945_v58  ;;  %v1842_v15 = vadd.f32 1e-05, %v1712_v29  ;;  %v2006_v58 = vmul.f32 %v5139_v14, %v1936_v0  ;;  %v5951_v21 = vsub.f32 %v5949_v53, %v5950_v23  ;;  %v5174_v0 = vld [vmem:[%s5658_s3] ss:$0 sm:$0xff]  ;;  %v5952_v53 = vld [vmem:[#allocation59_spill] sm:$0xff] }
 0x30d   : > { %v1802_v42 = vadd.f32 1e-05, %v1672_v59  ;;  %v1546_v17 = vmul.f32 0.0625, %v1396_v39  ;;  %v5154_v59 = vmul.f32 %v5116_v22, %v5116_v22  ;;  %v5168_v29 = vmul.f32 0.0625, %v5026_v19 }
 0x30e   : > { %v2010_v18 = vmul.f32 %v5139_v14, %v1940_v56  ;;  %v2012_v19 = vmul.f32 %v5139_v14, %v1942_v63 }
 0x30f   : > { %v3157_v12 = vpop.eup %3156  ;;  %3164 = vrsqrt.f32 %v1802_v42  ;;  %v1674_v57 = vsub.f32 %v1546_v17, %v5033_v5  ;;  %v5157_v39 = vpop.xlane.xlu0 %1518  ;;  %v2007_v5 = vmul.f32 %v5139_v14, %v1937_v1  ;;  %v2078_v17 = vadd.f32 %v5174_v0, %v2008_v28 }
 0x310   : > { %3166 = vrsqrt.f32 %v1840_v61  ;;  %v1939_v24 = vmul.f32 %v3157_v12, %v5951_v21  ;;  %v1402_v11 = vpop.xlane.xlu1 %1401  ;;  %v2076_v21 = vadd.f32 %v5174_v0, %v2006_v58  ;;  %v5953_v28 = vsub.f32 %v5911_v26, %v4877_v60 }
 0x311   : > { %v1804_v42 = vadd.f32 1e-05, %v1674_v57  ;;  %v1548_v20 = vmul.f32 0.0625, %v1402_v11  ;;  %3168 = vrsqrt.f32 %v1842_v15  ;;  %v5181_v57 = vmul.f32 0.0625, %v5952_v53 }
 0x312   : > { %v2009_v61 = vmul.f32 %v5139_v14, %v1939_v24  ;;  %v5189_v24 = vmul.f32 0.0625, %v5088_v16  ;;  %v2320_v36 = vcombine.low %v2076_v21, %v2078_v17  ;;  %v2080_v60 = vadd.f32 %v5174_v0, %v2010_v18 }
 0x313   : > { %v3159_v12 = vpop.eup %3158  ;;  %3170 = vrsqrt.f32 %v1804_v42  ;;  %v1676_v1 = vsub.f32 %v1548_v20, %v5045_v40  ;;  %v1387_v23 = vpop.xlane.xlu0 %1386  ;;  %v2077_v42 = vadd.f32 %v5174_v0, %v2007_v5  ;;  %v1714_v40 = vsub.f32 %v5168_v29, %v4935_v8  ;;  %v5960_v29 = vld [vmem:[#allocation54_spill] sm:$0xff] }
 0x314   : > { %v1941_v15 = vmul.f32 %v3159_v12, %v5953_v28  ;;  %v1543_v56 = vmul.f32 0.0625, %v1387_v23  ;;  %v1480_v11 = vpop.xlane.xlu1 %1479  ;;  %v2079_v63 = vadd.f32 %v5174_v0, %v2009_v61  ;;  %v2082_v26 = vadd.f32 %v5174_v0, %v2012_v19 }
 0x315   : > { %v1806_v4 = vadd.f32 1e-05, %v1676_v1  ;;  %v1574_v53 = vmul.f32 0.0625, %v1480_v11  ;;  %v5954_v5 = vsub.f32 %v5917_v37, %v4916_v51  ;;  %v5956_v11 = vld [vmem:[#allocation8_spill] sm:$0xff] }
 0x316   : > { %v1671_v58 = vsub.f32 %v1543_v56, %v5052_v3  ;;  %v2011_v61 = vmul.f32 %v5139_v14, %v1941_v15  ;;  %v2328_v1 = vcombine.low %v2077_v42, %v2079_v63  ;;  %v1711_v3 = vsub.f32 %v5189_v24, %v4971_v50 }
 0x317   : > { %v3161_v16 = vpop.eup %3160  ;;  %3172 = vrsqrt.f32 %v1806_v4  ;;  %v1702_v20 = vsub.f32 %v1574_v53, %v5068_v32  ;;  %v1393_v12 = vpop.xlane.xlu0 %1392  ;;  %v5955_v4 = vsub.f32 %v5928_v44, %v4983_v2  ;;  %v5209_v15 = vrot.slane %v2320_v36, %v5956_v11 }
 0x318   : > { %v3163_v23 = vpop.eup %3162  ;;  %v1943_v17 = vmul.f32 %v3161_v16, %v5954_v5  ;;  %v1801_v21 = vadd.f32 1e-05, %v1671_v58  ;;  %v1545_v18 = vmul.f32 0.0625, %v1393_v12  ;;  %v1486_v28 = vpop.xlane.xlu1 %1485  ;;  %v2336_v37 = vcombine.low %v2080_v60, %v2082_v26 }
 0x319   : > { %v1928_v19 = vmul.f32 %v3163_v23, %v5955_v4  ;;  %v1832_v32 = vadd.f32 1e-05, %v1702_v20  ;;  %v1576_v56 = vmul.f32 0.0625, %v1486_v28  ;;  %v2081_v58 = vadd.f32 %v5174_v0, %v2011_v61 }
 0x31a   : > { %3174 = vrsqrt.f32 %v1801_v21  ;;  %v1673_v63 = vsub.f32 %v1545_v18, %v5074_v33  ;;  %v2013_v51 = vmul.f32 %v5139_v14, %v1943_v17  ;;  %v5216_v2 = vrot.slane %v2328_v1, %v5956_v11 }
 0x31b   : > { %3176 = vrsqrt.f32 %v1832_v32  ;;  %v1704_v53 = vsub.f32 %v1576_v56, %v5084_v43  ;;  %v1399_v42 = vpop.xlane.xlu0 %1398  ;;  %v1998_v33 = vmul.f32 %v5139_v14, %v1928_v19  ;;  %v5957_v60 = vsub.f32 %v5929_v9, %v4986_v25 }
 0x31c   : > { %v3165_v44 = vpop.eup %3164  ;;  %v1803_v16 = vadd.f32 1e-05, %v1673_v63  ;;  %v1547_v20 = vmul.f32 0.0625, %v1399_v42  ;;  %v1492_v36 = vpop.xlane.xlu1 %1491  ;;  %v2083_v12 = vadd.f32 %v5174_v0, %v2013_v51  ;;  %v1585_v26 = vmul.f32 0.0625, %v5122_v6 }
 0x31d   : > { %v5220_v23 = vpop.eup %3166  ;;  %v1930_v43 = vmul.f32 %v3165_v44, %v5957_v60  ;;  %v1834_v61 = vadd.f32 1e-05, %v1704_v53  ;;  %v1578_v5 = vmul.f32 0.0625, %v1492_v36  ;;  %v5228_v17 = vrot.slane %v2336_v37, %v5956_v11 }
 0x31e   : > { %3178 = vrsqrt.f32 %v1803_v16  ;;  %v1675_v1 = vsub.f32 %v1547_v20, %v5092_v47  ;;  %v2344_v21 = vcombine.low %v2081_v58, %v2083_v12  ;;  %v5230_v18 = vpop.eup %3168  ;;  %v2352_v25 = vcombine.low %v5209_v15, %v5216_v2 }
 0x31f   : > { %3180 = vrsqrt.f32 %v1834_v61  ;;  %v1706_v28 = vsub.f32 %v1578_v5, %v5109_v41  ;;  %v1405_v4 = vpop.xlane.xlu0 %1404  ;;  %v2000_v9 = vmul.f32 %v5139_v14, %v1930_v43  ;;  %v5240_v63 = vadd.f32 %v5174_v0, %v1998_v33 }
 0x320   : > { %v3171_v6 = vpop.eup %3170  ;;  %v1805_v19 = vadd.f32 1e-05, %v1675_v1  ;;  %v1549_v32 = vmul.f32 0.0625, %v1405_v4  ;;  %v1498_v56 = vpop.xlane.xlu1 %1497  ;;  %v5237_v47 = vrot.slane %v2344_v21, %v5956_v11  ;;  %v5958_v51 = vsub.f32 %v5932_v54, %v4999_v27 }
 0x321   : > { %v1836_v37 = vadd.f32 1e-05, %v1706_v28  ;;  %v1580_v53 = vmul.f32 0.0625, %v1498_v56  ;;  %v5246_v42 = vadd.f32 %v5174_v0, %v2000_v9  ;;  %v1713_v58 = vsub.f32 %v1585_v26, %v4994_v7 }
 0x322   : > { %v1932_v41 = vmul.f32 %v3171_v6, %v5958_v51  ;;  %3182 = vrsqrt.f32 %v1805_v19  ;;  %v1677_v44 = vsub.f32 %v1549_v32, %v5128_v52  ;;  %v2368_v16 = vcombine.low %v5228_v17, %v5237_v47  ;;  %v5963_v51 = vld [vmem:[#allocation15_spill] sm:$0xff] }
 0x323   : > { %v1587_v20 = vmul.f32 0.0625, %v5157_v39  ;;  %3184 = vrsqrt.f32 %v1836_v37  ;;  %v1708_v36 = vsub.f32 %v1580_v53, %v5144_v46  ;;  %v1483_v27 = vpop.xlane.xlu0 %1482  ;;  %v2252_v54 = vcombine.low %v5240_v63, %v5246_v42  ;;  %v5964_v37 = vld [vmem:[#allocation55_spill] sm:$0xff] }
 0x324   : > { %v3173_v12 = vpop.eup %3172  ;;  %v1807_v33 = vadd.f32 1e-05, %v1677_v44  ;;  %v1575_v60 = vmul.f32 0.0625, %v1483_v27  ;;  %v1522_v43 = vpop.xlane.xlu1 %1521  ;;  %v5257_v7 = vrot.slane %v2352_v25, %v5858_v35  ;;  %v5260_v52 = vrot.slane %v2368_v16, %v5858_v35 }
 0x325   : > { %v5959_v39 = vsub.f32 %v5933_v62, %v5006_v34  ;;  %v1838_v61 = vadd.f32 1e-05, %v1708_v36  ;;  %v1588_v46 = vmul.f32 0.0625, %v1522_v43  ;;  %v2002_v5 = vmul.f32 %v5139_v14, %v1932_v41 }
 0x326   : > { %v1844_v1 = vadd.f32 1e-05, %v1714_v40  ;;  %3186 = vrsqrt.f32 %v1807_v33  ;;  %v1703_v21 = vsub.f32 %v1575_v60, %v5154_v59  ;;  %v2385_v28 = vcombine.high %v5257_v7, %v5260_v52  ;;  %v5961_v40 = vld [vmem:[#allocation17_spill] sm:$0xff] }
 0x327   : > { %v1934_v26 = vmul.f32 %v3173_v12, %v5959_v39  ;;  %v3175_v4 = vpop.eup %3174  ;;  %v1843_v25 = vadd.f32 1e-05, %v1713_v58  ;;  %3188 = vrsqrt.f32 %v1838_v61  ;;  %v1716_v62 = vsub.f32 %v1588_v46, %v4962_v30  ;;  %v1489_v34 = vpop.xlane.xlu0 %1488  ;;  %v5965_v30 = vld [vmem:[#allocation31_spill] sm:$0xff] }
 0x328   : > { %v3177_v6 = vpop.eup %3176  ;;  %v1841_v8 = vadd.f32 1e-05, %v1711_v3  ;;  %v5962_v19 = vsub.f32 %v5960_v29, %v5961_v40  ;;  %v1833_v32 = vadd.f32 1e-05, %v1703_v21  ;;  %v1577_v56 = vmul.f32 0.0625, %v1489_v34  ;;  %2674 = vrot.lane.b32.xlu1 %v2385_v28, %s3315_s29  ;;  %v5967_v3 = vld [vmem:[#allocation65_spill] sm:$0xff] }
 0x329   : > { %v2004_v9 = vmul.f32 %v5139_v14, %v1934_v26  ;;  %v1715_v41 = vsub.f32 %v1587_v20, %v5963_v51  ;;  %v5966_v53 = vsub.f32 %v5964_v37, %v5965_v30  ;;  %v5286_v44 = vadd.f32 %v5174_v0, %v2002_v5  ;;  %v5968_v26 = vld [vmem:[#allocation57_spill] sm:$0xff]  ;;  %v5969_v61 = vld [vmem:[#allocation19_spill] sm:$0xff]  ;;  %v5972_v34 = vld [vmem:[#allocation22_spill] sm:$0xff] }
 0x32a   : > { %v1929_v59 = vmul.f32 %v3175_v4, %v5962_v19  ;;  %v1643_v24 = vmul.f32 %v5181_v57, %v5181_v57  ;;  %v5294_v16 = vmul.f32 0.0625, %v5967_v3  ;;  %3190 = vrsqrt.f32 %v1833_v32  ;;  %v5297_v20 = vpop.permute.xlu1 %2678  ;;  %v5971_v4 = vld [vmem:[#allocation58_spill] sm:$0xff] }
 0x32b   : > { %v1960_v58 = vmul.f32 %v3177_v6, %v5966_v53  ;;  %v5289_v50 = vadd.f32 %v5174_v0, %v2004_v9  ;;  %v1705_v36 = vsub.f32 %v1577_v56, %v5162_v55  ;;  %v3179_v27 = vpop.eup %3178  ;;  %3192 = vrsqrt.f32 %v1843_v25  ;;  %v1495_v33 = vpop.xlane.xlu0 %1494 }
 0x32c   : > { %v1846_v12 = vadd.f32 1e-05, %v1716_v62  ;;  %v1999_v60 = vmul.f32 %v5139_v14, %v1929_v59  ;;  %v3181_v39 = vpop.eup %3180  ;;  %3194 = vrsqrt.f32 %v1844_v1  ;;  %v5970_v46 = vsub.f32 %v5968_v26, %v5969_v61  ;;  %v5977_v26 = vld [vmem:[#allocation64_spill] sm:$0xff] }
 0x32d   : > { %v2268_v43 = vcombine.low %v5286_v44, %v5289_v50  ;;  %v1835_v21 = vadd.f32 1e-05, %v1705_v36  ;;  %v1579_v28 = vmul.f32 0.0625, %v1495_v33  ;;  %3196 = vrsqrt.f32 %v1841_v8 }
 0x32e   : > { %v1931_v5 = vmul.f32 %v3179_v27, %v5970_v46  ;;  %v1845_v55 = vadd.f32 1e-05, %v1715_v41  ;;  %v5973_v25 = vsub.f32 %v5971_v4, %v5972_v34  ;;  %v2030_v9 = vmul.f32 %v5139_v14, %v1960_v58  ;;  %v5311_v29 = vpop.permute.xlu1 %2702 }
 0x32f   : > { %v1645_v6 = vmul.f32 %v5294_v16, %v5294_v16  ;;  %3198 = vrsqrt.f32 %v1835_v21  ;;  %v1707_v1 = vsub.f32 %v1579_v28, %v1643_v24  ;;  %v3183_v19 = vpop.eup %3182  ;;  %v1501_v8 = vpop.xlane.xlu0 %1500  ;;  %v2069_v32 = vadd.f32 %v5174_v0, %v1999_v60  ;;  %v5978_v21 = vld [vmem:[#allocation66_spill] sm:$0xff] }
 0x330   : > { %v1962_v62 = vmul.f32 %v3181_v39, %v5973_v25  ;;  %v2001_v40 = vmul.f32 %v5139_v14, %v1931_v5  ;;  %3200 = vrsqrt.f32 %v1846_v12  ;;  %v2384_v56 = vcombine.low %v5257_v7, %v5260_v52  ;;  %v3185_v51 = vpop.eup %3184  ;;  %v5976_v12 = vld [vmem:[#allocation63_spill] sm:$0xff] }
 0x331   : > { %v5974_v41 = vsub.f32 %v5941_v45, %v5060_v48  ;;  %v1837_v30 = vadd.f32 1e-05, %v1707_v1  ;;  %v1581_v53 = vmul.f32 0.0625, %v1501_v8  ;;  %3202 = vrsqrt.f32 %v1845_v55 }
 0x332   : > { %v2032_v59 = vmul.f32 %v5139_v14, %v1962_v62  ;;  %v2071_v58 = vadd.f32 %v5174_v0, %v2001_v40  ;;  %v5975_v24 = vsub.f32 %v5944_v10, %v5077_v38  ;;  %v5326_v36 = vadd.f32 %v5174_v0, %v2030_v9  ;;  %v2711_v45 = vpop.permute.xlu1 %2710  ;;  %v5979_v9 = vld [vmem:[#allocation69_spill] sm:$0xff] }
 0x333   : > { %v1933_v37 = vmul.f32 %v3183_v19, %v5974_v41  ;;  %v1743_v33 = vsub.f32 %v5976_v12, %v5095_v13  ;;  %3204 = vrsqrt.f32 %v1837_v30  ;;  %v1709_v48 = vsub.f32 %v1581_v53, %v1645_v6  ;;  %v3187_v39 = vpop.eup %3186  ;;  %v1525_v46 = vpop.xlane.xlu0 %1524  ;;  %v5982_v30 = vld [vmem:[#allocation13_spill] sm:$0xff]  ;;  %v5983_v53 = vld [vmem:[#allocation12_spill] sm:$0xff] }
 0x334   : > { %v1964_v3 = vmul.f32 %v3185_v51, %v5975_v24  ;;  %v5329_v27 = vadd.f32 %v5174_v0, %v2032_v59  ;;  %v2260_v60 = vcombine.low %v2069_v32, %v2071_v58  ;;  %v1774_v61 = vsub.f32 %v5977_v26, %v5112_v49  ;;  %v3189_v5 = vpop.eup %3188  ;;  %v5981_v59 = vld [vmem:[#allocation72_spill] sm:$0xff] }
 0x335   : > { %v2003_v10 = vmul.f32 %v5139_v14, %v1933_v37  ;;  %v1769_v13 = vsub.f32 %v5978_v21, %v5116_v22  ;;  %v1935_v28 = vmul.f32 %v3187_v39, %v1743_v33  ;;  %v1839_v55 = vadd.f32 1e-05, %v1709_v48  ;;  %v5980_v22 = vld [vmem:[#allocation75_spill] sm:$0xff]  ;;  %v5986_v33 = vld [vmem:[#allocation20_spill] sm:$0xff]  ;;  %v5988_v39 = vld [vmem:[#allocation14_spill] sm:$0xff] }
 0x336   : > { %v2524_v38 = vcombine.low %v5326_v36, %v5329_v27  ;;  %v1589_v4 = vmul.f32 0.0625, %v1525_v46  ;;  %v1966_v34 = vmul.f32 %v3189_v5, %v1774_v61  ;;  %v2034_v25 = vmul.f32 %v5139_v14, %v1964_v3  ;;  %v2735_v40 = vpop.permute.xlu1 %2734  ;;  %v5989_v26 = vld [vmem:[#allocation16_spill] sm:$0xff] }
 0x337   : > { %v5345_v49 = vrot.slane %v2252_v54, %v5956_v11  ;;  %v5348_v62 = vrot.slane %v2260_v60, %v5956_v11  ;;  %v1771_v6 = vsub.f32 %v5979_v9, %v5131_v31  ;;  %3206 = vrsqrt.f32 %v1839_v55  ;;  %v3191_v8 = vpop.eup %3190  ;;  %v2671_v63 = vpop.permute.xlu0 %2670  ;;  %v5992_v9 = vld [vmem:[#allocation71_spill] sm:$0xff] }
 0x338   : > { %v1717_v1 = vsub.f32 %v1589_v4, %v5980_v22  ;;  %v2005_v19 = vmul.f32 %v5139_v14, %v1935_v28  ;;  %v1773_v32 = vsub.f32 %v5981_v59, %v5181_v57  ;;  %v2036_v42 = vmul.f32 %v5139_v14, %v1966_v34  ;;  %v3193_v31 = vpop.eup %3192  ;;  %v5985_v57 = vld [vmem:[#allocation37_spill] sm:$0xff] }
 0x339   : > { %v2073_v54 = vadd.f32 %v5174_v0, %v2003_v10  ;;  %v2285_v51 = vcombine.high %v5345_v49, %v5348_v62  ;;  %v1961_v41 = vmul.f32 %v3191_v8, %v1769_v13  ;;  %v5984_v58 = vcombine.low %v5982_v30, %v5983_v53  ;;  %v3195_v12 = vpop.eup %3194  ;;  %v5991_v34 = vld [vmem:[#allocation45_spill] sm:$0xff]  ;;  %v5994_v8 = vld [vmem:[#allocation74_spill] sm:$0xff] }
 0x33a   : > { %v1847_v37 = vadd.f32 1e-05, %v1717_v1  ;;  %v2075_v3 = vadd.f32 %v5174_v0, %v2005_v19  ;;  %v5987_v48 = vsub.f32 %v5985_v57, %v5986_v33  ;;  %v5990_v61 = vcombine.low %v5988_v39, %v5989_v26  ;;  %v3197_v21 = vpop.eup %3196  ;;  %v2743_v28 = vpop.permute.xlu1 %2742  ;;  %v6001_v33 = vld [vmem:[#allocation43_spill] sm:$0xff] }
 0x33b   : > { %v2758_v24 = vsel %vm2756_vm2, %v5984_v58, %v2671_v63  ;;  %v5376_v10 = vadd.f32 %v5174_v0, %v2034_v25  ;;  %v5379_v5 = vadd.f32 %v5174_v0, %v2036_v42  ;;  %v2031_v1 = vmul.f32 %v5139_v14, %v1961_v41 }
 0x33c   : > { %v1968_v60 = vmul.f32 %v5220_v23, %v5987_v48  ;;  %v2762_v46 = vsel %vm2756_vm2, %v5990_v61, %v5297_v20  ;;  %3208 = vrsqrt.f32 %v1847_v37  ;;  %v2766_v23 = vsel %vm234_vm0, %v2758_v24, %v5311_v29  ;;  %v3199_v4 = vpop.eup %3198  ;;  %v5999_v37 = vld [vmem:[#allocation68_spill] sm:$0xff]  ;;  %v6002_v48 = vld [vmem:[#allocation70_spill] sm:$0xff] }
 0x33d   : > { %v2770_v13 = vsel %vm234_vm0, %v2762_v46, %v2711_v45  ;;  %v2276_v55 = vcombine.low %v2073_v54, %v2075_v3  ;;  %v5993_v20 = vsub.f32 %v5991_v34, %v5992_v9  ;;  %v2540_v19 = vcombine.low %v5376_v10, %v5379_v5  ;;  %v3201_v45 = vpop.eup %3200  ;;  %v5995_v54 = vld [vmem:[#allocation39_spill] sm:$0xff] }
 0x33e   : > { %v5388_v25 = vsel %vm2773_vm3, %v2770_v13, %v2743_v28  ;;  %v1775_v59 = vsub.f32 %v5994_v8, %v5294_v16  ;;  %v1963_v29 = vmul.f32 %v3199_v4, %v1771_v6  ;;  %v2275_v63 = vrot.slane %v2268_v43, %v5956_v11  ;;  %v5998_v6 = vld [vmem:[#allocation44_spill] sm:$0xff]  ;;  %v3203_v3 = vpop.eup %3202  ;;  %v6004_v13 = vld [vmem:[#allocation41_spill] sm:$0xff]  ;;  %v6008_v9 = vld [vmem:[#allocation11_spill] sm:$0xff] }
 0x33f   : > { %v1971_v22 = vmul.f32 %v3193_v31, %v5993_v20  ;;  %2787 = vst.msk [vmem:[%s5397_s8 + $0x50] sm:$0xff] %vm234_vm0, %v5388_v25  ;;  %v2283_v42 = vrot.slane %v2276_v55, %v5956_v11  ;;  %v5996_v31 = vld [vmem:[#allocation56_spill] sm:$0xff]  ;;  %v6000_v30 = vsub.f32 %v5998_v6, %v5999_v37  ;;  %v2284_v58 = vcombine.low %v5345_v49, %v5348_v62 }
 0x340   : > { %v5997_v41 = vsub.f32 %v5995_v54, %v5996_v31  ;;  %v5417_v24 = vsel %vm2773_vm3, %v2766_v23, %v2735_v40  ;;  %v2033_v44 = vmul.f32 %v5139_v14, %v1963_v29  ;;  %v2038_v43 = vmul.f32 %v5139_v14, %v1968_v60  ;;  %v6005_v23 = vld [vmem:[#allocation62_spill] sm:$0xff] }
 0x341   : > { %v1969_v53 = vmul.f32 %v3197_v21, %v6000_v30  ;;  %v2301_v50 = vcombine.high %v2275_v63, %v2283_v42  ;;  %v2300_v57 = vcombine.low %v2275_v63, %v2283_v42  ;;  %2783 = vst.msk [vmem:[%s5397_s8 + $0x10] sm:$0xff] %vm234_vm0, %v5417_v24  ;;  %v6003_v39 = vsub.f32 %v6001_v33, %v6002_v48 }
 0x342   : > { %v1970_v16 = vmul.f32 %v5230_v18, %v5997_v41  ;;  %v3205_v18 = vpop.eup %3204  ;;  %v2101_v49 = vadd.f32 %v5174_v0, %v2031_v1  ;;  %v5429_v62 = vrot.slane %v2285_v51, %v5858_v35  ;;  %v2041_v40 = vmul.f32 %v5139_v14, %v1971_v22 }
 0x343   : > { %v1974_v26 = vmul.f32 %v3201_v45, %v6003_v39  ;;  %v1965_v61 = vmul.f32 %v3205_v18, %v1773_v32  ;;  %v2103_v46 = vadd.f32 %v5174_v0, %v2033_v44  ;;  %v5434_v60 = vrot.slane %v2301_v50, %v5858_v35  ;;  %v6007_v32 = vld [vmem:[#allocation46_spill] sm:$0xff] }
 0x344   : > { %v5437_v21 = vrot.slane %v2300_v57, %v5858_v35  ;;  %v6006_v28 = vsub.f32 %v6004_v13, %v6005_v23  ;;  %v2039_v4 = vmul.f32 %v5139_v14, %v1969_v53  ;;  %v2040_v51 = vmul.f32 %v5139_v14, %v1970_v16  ;;  %v3207_v29 = vpop.eup %3206 }
 0x345   : > { %v5445_v34 = vrot.slane %v2284_v58, %v5858_v35  ;;  %v6009_v20 = vsub.f32 %v6007_v32, %v6008_v9  ;;  %v2532_v1 = vcombine.low %v2101_v49, %v2103_v46  ;;  %v2318_v45 = vcombine.low %v5429_v62, %v5434_v60  ;;  %v6010_v58 = vld [vmem:[#allocation73_spill] sm:$0xff] }
 0x346   : > { %v1972_v55 = vmul.f32 %v3195_v12, %v6006_v28  ;;  %v2319_v8 = vcombine.high %v5429_v62, %v5434_v60  ;;  %v2044_v12 = vmul.f32 %v5139_v14, %v1974_v26  ;;  %v2111_v63 = vadd.f32 %v5174_v0, %v2041_v40 }
 0x347   : > { %v1973_v22 = vmul.f32 %v3203_v3, %v6009_v20  ;;  %v2317_v42 = vcombine.high %v5445_v34, %v5437_v21  ;;  %v2316_v54 = vcombine.low %v5445_v34, %v5437_v21  ;;  %v1967_v31 = vmul.f32 %v3207_v29, %v1775_v59  ;;  %v6011_v3 = vld [vmem:[#allocation47_spill] sm:$0xff] }
 0x348   : > { %v2035_v41 = vmul.f32 %v5139_v14, %v1965_v61  ;;  %v2531_v16 = vrot.slane %v2524_v38, %v5956_v11  ;;  %v2539_v6 = vrot.slane %v2532_v1, %v5956_v11  ;;  %v2042_v37 = vmul.f32 %v5139_v14, %v1972_v55 }
 0x349   : > { %v2109_v30 = vadd.f32 %v5174_v0, %v2039_v4  ;;  %v2110_v53 = vadd.f32 %v5174_v0, %v2040_v51  ;;  %v1783_v44 = vsub.f32 %v6011_v3, %v6010_v58  ;;  %v2037_v59 = vmul.f32 %v5139_v14, %v1967_v31  ;;  %v3209_v18 = vpop.eup %3208 }
 0x34a   : > { %v2556_v50 = vcombine.low %v2531_v16, %v2539_v6  ;;  %v2557_v57 = vcombine.high %v2531_v16, %v2539_v6  ;;  %v2108_v33 = vadd.f32 %v5174_v0, %v2038_v43  ;;  %v2114_v36 = vadd.f32 %v5174_v0, %v2044_v12 }
 0x34b   : > { %v2600_v27 = vcombine.low %v2109_v30, %v2111_v63  ;;  %v1975_v38 = vmul.f32 %v3209_v18, %v1783_v44  ;;  %v2105_v48 = vadd.f32 %v5174_v0, %v2035_v41  ;;  %v2107_v39 = vadd.f32 %v5174_v0, %v2037_v59  ;;  %v6013_v18 = vld [vmem:[#allocation48_spill] sm:$0xff] }
 0x34c   : > { %v2043_v26 = vmul.f32 %v5139_v14, %v1973_v22  ;;  %v2112_v49 = vadd.f32 %v5174_v0, %v2042_v37  ;;  %v2592_v40 = vcombine.low %v2108_v33, %v2110_v53  ;;  %v2547_v43 = vrot.slane %v2540_v19, %v5956_v11 }
 0x34d   : > { %v2548_v61 = vcombine.low %v2105_v48, %v2107_v39  ;;  %v2045_v46 = vmul.f32 %v5139_v14, %v1975_v38  ;;  %v2607_v13 = vrot.slane %v2600_v27, %v5956_v11  ;;  %v5489_v14 = vrot.slane %v2556_v50, %v5858_v35  ;;  %v6016_v48 = vld [vmem:[#allocation10_spill] sm:$0xff] }
 0x34e   : > { %v2608_v23 = vcombine.low %v2112_v49, %v2114_v36  ;;  %v2113_v55 = vadd.f32 %v5174_v0, %v2043_v26  ;;  %v2599_v51 = vrot.slane %v2592_v40, %v5956_v11  ;;  %v2571_v19 = vrot.slane %v2557_v57, %v5858_v35  ;;  %v6012_v57 = vld [vmem:[#allocation18_spill] sm:$0xff] }
 0x34f   : > { %v2555_v28 = vrot.slane %v2548_v61, %v5956_v11  ;;  %v2115_v4 = vadd.f32 %v5174_v0, %v2045_v46  ;;  %v2369_v31 = vcombine.high %v5228_v17, %v5237_v47  ;;  %v2353_v37 = vcombine.high %v5209_v15, %v5216_v2 }
 0x350   : > { %v2615_v22 = vrot.slane %v2608_v23, %v5956_v11  ;;  %v2624_v1 = vcombine.low %v2599_v51, %v2607_v13  ;;  %v2625_v3 = vcombine.high %v2599_v51, %v2607_v13  ;;  %v6014_v33 = vcombine.low %v6012_v57, %v6013_v18 }
 0x351   : > { %v2572_v32 = vcombine.low %v2547_v43, %v2555_v28  ;;  %v2616_v9 = vcombine.low %v2113_v55, %v2115_v4  ;;  %v2573_v20 = vcombine.high %v2547_v43, %v2555_v28  ;;  %v2383_v17 = vrot.slane %v2369_v31, %v5858_v35 }
 0x352   : > { %v2367_v58 = vrot.slane %v2353_v37, %v5858_v35  ;;  %v2639_v15 = vrot.slane %v2625_v3, %v5858_v35 }
 0x353   : > { %v5493_v10 = vrot.slane %v2572_v32, %v5858_v35  ;;  %v2623_v5 = vrot.slane %v2616_v9, %v5956_v11  ;;  %v2587_v0 = vrot.slane %v2573_v20, %v5858_v35  ;;  %v5506_v11 = vrot.slane %v2624_v1, %v5858_v35 }
 0x354   : > { %v2386_v44 = vcombine.low %v2367_v58, %v2383_v17 }
 0x355   : > { %v2589_v29 = vcombine.high %v5489_v14, %v5493_v10  ;;  %v2640_v12 = vcombine.low %v2615_v22, %v2623_v5  ;;  %v2590_v63 = vcombine.low %v2571_v19, %v2587_v0  ;;  %v2591_v41 = vcombine.high %v2571_v19, %v2587_v0 }
 0x356   : > { %v2588_v16 = vcombine.low %v5489_v14, %v5493_v10  ;;  %v2641_v47 = vcombine.high %v2615_v22, %v2623_v5 }
 0x357   : > { %2680 = vrot.lane.b32.xlu0 %v2589_v29, %s3315_s29  ;;  %v5509_v6 = vrot.slane %v2640_v12, %v5858_v35 }
 0x358   : > { %v2655_v59 = vrot.slane %v2641_v47, %v5858_v35 }
 0x359   : > { %v2657_v30 = vcombine.high %v5506_v11, %v5509_v6  ;;  %v2656_v53 = vcombine.low %v5506_v11, %v5509_v6 }
 0x35a   : > { %v2658_v2 = vcombine.low %v2639_v15, %v2655_v59  ;;  %v2659_v50 = vcombine.high %v2639_v15, %v2655_v59  ;;  %v2669_v60 = vpop.permute.xlu1 %2668 }
 0x35b   : > { %2704 = vrot.lane.b32.xlu0 %v2318_v45, %s3316_s30  ;;  %2682 = vrot.lane.b32.xlu1 %v2657_v30, %s3315_s29  ;;  %v2387_v45 = vcombine.high %v2367_v58, %v2383_v17  ;;  %v2757_v36 = vsel %vm2756_vm2, %v6014_v33, %v2669_v60 }
 0x35f   : > { %2712 = vrot.lane.b32.xlu0 %v2590_v63, %s3316_s30  ;;  %2706 = vrot.lane.b32.xlu1 %v2386_v44, %s3316_s30 }
 0x363   : > { %2736 = vrot.lane.b32.xlu0 %v2319_v8, %s3317_s5  ;;  %2714 = vrot.lane.b32.xlu1 %v2658_v2, %s3316_s30 }
 0x367   : > { %2744 = vrot.lane.b32.xlu0 %v2591_v41, %s3317_s5  ;;  %2738 = vrot.lane.b32.xlu1 %v2387_v45, %s3317_s5 }
 0x36a   : > { %v2677_v35 = vpop.permute.xlu0 %2676 }
 0x36b   : > { %2672 = vrot.lane.b32.xlu1 %v2317_v42, %s3315_s29  ;;  %s3244_s29 = sshll.u32 %s3318_s25, 4  ;;  %s3245_s29 = int_to_ptr.vmem [resolvable:$false] %s3244_s29 }
 0x36c   : > { %s3246_s30 = scalar_lea.vmem %s3245_s29, 4096 }
 0x36e   : > { %v2701_v62 = vpop.permute.xlu0 %2700 }
 0x36f   : > { %2746 = vrot.lane.b32.xlu1 %v2659_v50, %s3317_s5  ;;  %v2765_v42 = vsel %vm234_vm0, %v2757_v36, %v2701_v62 }
 0x372   : > { %v2709_v8 = vpop.permute.xlu0 %2708 }
 0x373   : > { %2800 = vrot.lane.b32.xlu1 %v5417_v24, %s3310_s11  ;;  %v6015_v24 = vld [vmem:[#allocation67_spill] sm:$0xff] }
 0x374   : > { %v6017_v39 = vcombine.low %v6015_v24, %v6016_v48 }
 0x376   : > { %v2733_v27 = vpop.permute.xlu0 %2732  ;;  %v2761_v26 = vsel %vm2756_vm2, %v6017_v39, %v2677_v35 }
 0x377   : > { %2808 = vrot.lane.b32.xlu1 %v5388_v25, %s3310_s11  ;;  %v2774_v38 = vsel %vm2773_vm3, %v2765_v42, %v2733_v27  ;;  %v2769_v25 = vsel %vm234_vm0, %v2761_v26, %v2709_v8 }
 0x378   : > { %2782 = vst.msk [vmem:[%s5397_s8] sm:$0xff] %vm234_vm0, %v2774_v38  ;;  %2798 = vrot.lane.b32.xlu0 %v2774_v38, %s3310_s11 }
 0x37a   : > { %v2741_v49 = vpop.permute.xlu0 %2740 }
 0x37b   : > { %v2778_v40 = vsel %vm2773_vm3, %v2769_v25, %v2741_v49 }
 0x37c   : > { %2786 = vst.msk [vmem:[%s5397_s8 + $0x40] sm:$0xff] %vm234_vm0, %v2778_v40  ;;  %2806 = vrot.lane.b32.xlu0 %v2778_v40, %s3310_s11 }
 0x39a   : > { %v2675_v61 = vpop.permute.xlu1 %2674 }
 0x39b   : > { %v2760_v51 = vsel %vm2756_vm2, %v2384_v56, %v2675_v61 }
 0x3c9   : > { %v2681_v46 = vpop.permute.xlu0 %2680 }
 0x3ca   : > { %v2763_v32 = vsel %vm2756_vm2, %v2588_v16, %v2681_v46 }
 0x3cd   : > { %v2705_v13 = vpop.permute.xlu0 %2704  ;;  %v2683_v23 = vpop.permute.xlu1 %2682 }
 0x3ce   : > { %v2764_v5 = vsel %vm2756_vm2, %v2656_v53, %v2683_v23 }
 0x3d1   : > { %v2713_v43 = vpop.permute.xlu0 %2712  ;;  %v2707_v28 = vpop.permute.xlu1 %2706 }
 0x3d2   : > { %v2771_v9 = vsel %vm234_vm0, %v2763_v32, %v2713_v43  ;;  %v2768_v20 = vsel %vm234_vm0, %v2760_v51, %v2707_v28 }
 0x3d5   : > { %v2737_v55 = vpop.permute.xlu0 %2736  ;;  %v2715_v4 = vpop.permute.xlu1 %2714 }
 0x3d6   : > { %v2772_v0 = vsel %vm234_vm0, %v2764_v5, %v2715_v4 }
 0x3d9   : > { %v2745_v14 = vpop.permute.xlu0 %2744  ;;  %v2739_v22 = vpop.permute.xlu1 %2738 }
 0x3da   : > { %v2780_v1 = vsel %vm2773_vm3, %v2771_v9, %v2745_v14  ;;  %v2777_v10 = vsel %vm2773_vm3, %v2768_v20, %v2739_v22 }
 0x3db   : > { %2788 = vst.msk [vmem:[%s5397_s8 + $0x60] sm:$0xff] %vm234_vm0, %v2780_v1  ;;  %2785 = vst.msk [vmem:[%s5397_s8 + $0x30] sm:$0xff] %vm234_vm0, %v2777_v10  ;;  %2804 = vrot.lane.b32.xlu1 %v2777_v10, %s3310_s11 }
 0x3dd   : > { %v2673_v7 = vpop.permute.xlu1 %2672 }
 0x3de   : > { %v2759_v52 = vsel %vm2756_vm2, %v2316_v54, %v2673_v7 }
 0x3df   : > { %v2767_v56 = vsel %vm234_vm0, %v2759_v52, %v2705_v13 }
 0x3e0   : > { %v2776_v19 = vsel %vm2773_vm3, %v2767_v56, %v2737_v55 }
 0x3e1   : > { %2802 = vrot.lane.b32.xlu0 %v2776_v19, %s3310_s11  ;;  %2784 = vst.msk [vmem:[%s5397_s8 + $0x20] sm:$0xff] %vm234_vm0, %v2776_v19  ;;  %v2747_v21 = vpop.permute.xlu1 %2746 }
 0x3e2   : > { %v2781_v34 = vsel %vm2773_vm3, %v2772_v0, %v2747_v21 }
 0x3e3   : > { %2789 = vst.msk [vmem:[%s5397_s8 + $0x70] sm:$0xff] %vm234_vm0, %v2781_v34  ;;  %2812 = vrot.lane.b32.xlu1 %v2781_v34, %s3310_s11 }
 0x3e5   : > { %2810 = vrot.lane.b32.xlu0 %v2780_v1, %s3310_s11  ;;  %v2801_v54 = vpop.permute.xlu1 %2800  ;;  %s2846_s11 = sshll.u32 %s5397_s8, 4  ;;  %s5608_s11 = int_to_ptr.vmem [resolvable:$true] %s2846_s11 }
 0x3e6   : > { %2947 = vst.msk [vmem:[%s5397_s8 + $0x18] sm:$0xff] %vm234_vm0, %v2801_v54  ;;  %s3240_s23 = scalar_lea.vmem %s5608_s11, 2048  ;;  %p3247_p5 = scmp.lt.s32.totalorder %s5608_s11, %s3245_s29 }
 0x3e7   : > { %p3241_p11 = scmp.ne.s32.totalorder %s5608_s11, %s3240_s23  ;;  %p3248_p7 = scmp.lt.s32.totalorder %s3246_s30, %s3240_s23 }
 0x3e9   : > { %v2809_v29 = vpop.permute.xlu1 %2808  ;;  %p3242_p13 = pnand %p3241_p11, %p6018_p12  ;;  %p3249_p8 = por %p3248_p7, %p3247_p5 }
 0x3ea   : > { %2951 = vst.msk [vmem:[%s5397_s8 + $0x58] sm:$0xff] %vm234_vm0, %v2809_v29  ;;  %v2799_v12 = vpop.permute.xlu0 %2798 }
 0x3eb   : > { %2946 = vst.msk [vmem:[%s5397_s8 + $0x8] sm:$0xff] %vm234_vm0, %v2799_v12  ;;  %p3243_p4 = pneg %p3242_p13 }
 0x3ed   : > { %p3250_p10 = pnand %p3249_p8, %p3243_p4 }
 0x3ee   : > { %v2807_v63 = vpop.permute.xlu0 %2806 }
 0x3ef   : > { %2950 = vst.msk [vmem:[%s5397_s8 + $0x48] sm:$0xff] %vm234_vm0, %v2807_v63 }
 0x44d   : > { %v2805_v31 = vpop.permute.xlu1 %2804 }
 0x44e   : > { %2949 = vst.msk [vmem:[%s5397_s8 + $0x38] sm:$0xff] %vm234_vm0, %v2805_v31 }
 0x453   : > { %v2803_v41 = vpop.permute.xlu0 %2802 }
 0x454   : > { %2948 = vst.msk [vmem:[%s5397_s8 + $0x28] sm:$0xff] %vm234_vm0, %v2803_v41 }
 0x455   : > { %v2813_v16 = vpop.permute.xlu1 %2812 }
 0x456   : > { %2953 = vst.msk [vmem:[%s5397_s8 + $0x78] sm:$0xff] %vm234_vm0, %v2813_v16 }
 0x457   : > { %v2811_v11 = vpop.permute.xlu0 %2810 }
 0x458   : > { %2952 = vst.msk [vmem:[%s5397_s8 + $0x68] sm:$0xff] %vm234_vm0, %v2811_v11 }
 0x459   : > { %3253 = shalt.err (!%p3250_p10)
}
 0x45a   : > { %s3254_s5 = scalar_lea.hbm %s5606_s26, 2048  ;;  %s3258_s9 = scalar_lea.hbm %s5659_s4, 4096 }
 0x45b   : > { %p3255_p0 = scmp.ne.s32.totalorder %s5606_s26, %s3254_s5  ;;  %p3259_p1 = scmp.lt.s32.totalorder %s5606_s26, %s5659_s4 }
 0x45c   : > { %p3260_p3 = scmp.lt.s32.totalorder %s3258_s9, %s3254_s5 }
 0x45d   : > { %p3256_p2 = pnand %p3255_p0, %p6018_p12 }
 0x45e   : > { %p3261_p6 = por %p3260_p3, %p3259_p1 }
 0x45f   : > { %p3257_p9 = pneg %p3256_p2 }
 0x461   : > { %p3262_p11 = pnand %p3261_p6, %p3257_p9 }
 0x463   : > { %3265 = shalt.err (!%p3262_p11)
}
 0x464   : > { %s3319_s8 = smov 128   ;;  %s3320_s10 = smov 8  }
 0x465   : > { %3025 = dma.vmem_to_hbm [thread:$0]  (%p6018_p12), %s5608_s11, 2048, %s5606_s26, %s2832_s19, %s3319_s8, %s3319_s8, %s3320_s10  }
 0x466 PF: > { %s2861_s22 = sand.u32 1, %s3292_s15   ;;  %p6019_p13 = scmp.ne.s32.totalorder %s5775_s28, 0 }
 0x467   : > { %p6020_p4 = scmp.ge.s32.totalorder %s3304_s18, 2  ;;  %s2862_s12 = scalar_lea.sflag [#allocation4], %s2861_s22 }
 0x469   : > { %p3032_p5 = pnand %p6020_p4, %p6019_p13 }
 0x46b   : > { %p3033_p7 = pneg %p3032_p5 }
 0x46d   : > { %3287 = dma.done.wait (%p3033_p7), %s2862_s12, 2048  }
 0x46e   : > { %3289 = vsyncadd (%p3033_p7), %s2862_s12, 4294965248  ;;  %p17_p8 = scmp.ge.s32.totalorder %s3371_s21, 4   ;;  %s6021_s15 = smov %s3296_s16 }
 0x46f   : > { %s6022_s16 = smov %s3300_s17  ;;  %s6023_s17 = smov %s3383_s24 }
 0x470   : > { %s6024_s18 = smov %s3371_s21  ;;  %19 = sbr.rel (!%p17_p8) target bundleno = 5 (0x5), region = 82 }
 0x475   :  { %2867 = vsyncpa [#allocation3], 1 }
 0x476   :  { %2869 = vsyncpa [#allocation3 + $0x1], 1 }
 0x477   :  { %2870 = vsyncpa [#allocation4], 1 }
 0x478   :  { %2872 = vsyncpa [#allocation4 + $0x1], 1 }

</bundles_post_ra>
